<compile_context>
chip_gen: v7x
topology: tpu7x:2x2x1
jax: 0.10.0
libtpu: 0.0.40
codegen_flags: <defaults>
</compile_context>

<pallas_src>
import jax
import jax.numpy as jnp
from jax import lax
from jax.experimental import pallas as pl
from jax.experimental.pallas import tpu as pltpu

K = 5      # kernel size
PAD = 2    # ConvTranspose2d padding (also the equivalent-conv "same" pad)
CIN = 32
COUT = 32


def _make_kernel(H, W, OFF):
    HW = H * W

    def kernel(x_ref, w_ref, b_ref, o_ref, xpad_ref, s_ref):
        # x_ref   : (1, CIN, H*W)      one batch element, NCHW flattened (lane-dense)
        # w_ref   : (K, COUT, K*CIN)   equivalent-conv weight, packed per kernel row
        # b_ref   : (COUT, 1)          bias
        # o_ref   : (1, COUT, H*W)     output, NCHW flattened (lane-dense)
        # xpad_ref: (CIN, 2*OFF+H*W)   zero-padded flat input (VMEM scratch)
        # s_ref   : (K*CIN, H*W)       per-row im2col slab (VMEM scratch)

        # Zero-padded flat copy: x[c, h, w] lives at lane OFF + h*W + w.
        # OFF is a 128-lane multiple so the interior store is fully aligned.
        xpad_ref[...] = jnp.zeros_like(xpad_ref)
        xpad_ref[:, OFF:OFF + HW] = x_ref[0]

        # Per-tap-column validity masks: output column w reads input column
        # w + v - PAD, which must stay inside [0, W) (row-wrap guard).
        wcol = lax.broadcasted_iota(jnp.int32, (CIN, HW), 1) % W
        masks = [(wcol + v >= PAD) & (wcol + v < W + PAD) for v in range(K)]

        acc = jnp.zeros((COUT, HW), dtype=jnp.float32)
        base = OFF - PAD * W - PAD
        for u in range(K):                         # kernel rows
            for v in range(K):                     # kernel cols -> contraction packing
                start = base + u * W + v           # contiguous lane window (shift trick)
                sl = xpad_ref[:, start:start + HW]         # (CIN, HW)
                if v != PAD:                                # center column never wraps
                    sl = jnp.where(masks[v], sl, 0.0)
                s_ref[v * CIN:(v + 1) * CIN, :] = sl
            # One MXU matmul per kernel row: contraction depth = K*CIN = 160.
            acc = acc + jnp.dot(w_ref[u], s_ref[...],
                                preferred_element_type=jnp.float32)

        o_ref[0] = (acc + b_ref[...]).astype(o_ref.dtype)   # bias broadcast over lanes

    return kernel


@jax.jit
def decoder_forward(x_nchw, weight_t, bias):
    """ConvTranspose2d(32, 32, 5, stride=1, padding=2) forward.

    x_nchw  : (N, 32, H, W)   float32
    weight_t: (32, 32, 5, 5)  ConvTranspose2d weight (in, out, kH, kW)
    bias    : (32,)           ConvTranspose2d bias
    returns : (N, 32, H, W)
    """
    N, Cin, H, W = x_nchw.shape
    assert Cin == CIN
    HW = H * W

    # Equivalent "same"-conv weight: flip spatially, move channels, pack as
    # (kernel_row, COUT, kernel_col*CIN) to feed the K-packed matmul directly.
    w_flip = jnp.flip(weight_t, axis=(2, 3))                    # (CIN, COUT, K, K)
    w_r = jnp.transpose(w_flip, (2, 1, 3, 0)).reshape(K, COUT, K * CIN)
    b2 = bias.reshape(COUT, 1)

    # Free (contiguous) reshape only: keep NCHW, flatten spatial dims so the
    # lane axis is H*W -> lane-dense input and output, no pad/transpose passes.
    x2 = x_nchw.reshape(N, CIN, HW)

    # Flat-pad offset: >= PAD*W + PAD, rounded up to a 128-lane boundary.
    OFF = ((PAD * W + PAD + 127) // 128) * 128
    FLATP = 2 * OFF + HW

    out = pl.pallas_call(
        _make_kernel(H, W, OFF),
        out_shape=jax.ShapeDtypeStruct((N, COUT, HW), x_nchw.dtype),
        grid_spec=pltpu.PrefetchScalarGridSpec(
            num_scalar_prefetch=0,
            grid=(N,),
            in_specs=[
                pl.BlockSpec((1, CIN, HW), lambda n: (n, 0, 0)),
                pl.BlockSpec((K, COUT, K * CIN), lambda n: (0, 0, 0)),
                pl.BlockSpec((COUT, 1), lambda n: (0, 0)),
            ],
            out_specs=pl.BlockSpec((1, COUT, HW), lambda n: (n, 0, 0)),
            scratch_shapes=[
                pltpu.VMEM((CIN, FLATP), jnp.float32),      # padded flat input
                pltpu.VMEM((K * CIN, HW), jnp.float32),     # per-row im2col slab
            ],
        ),
        compiler_params=pltpu.CompilerParams(
            dimension_semantics=("parallel",)),
    )(x2, w_r, b2)

    return out.reshape(N, COUT, H, W)


def _reference(x_nchw, weight_t, bias):
    # Pure-JAX reference: stride-1 conv-transpose == flipped "same" convolution.
    w_oihw = jnp.transpose(jnp.flip(weight_t, axis=(2, 3)), (1, 0, 2, 3))
    y = lax.conv_general_dilated(
        x_nchw, w_oihw, window_strides=(1, 1), padding="SAME",
        dimension_numbers=("NCHW", "OIHW", "NCHW"))
    return y + bias[None, :, None, None]


if __name__ == "__main__":
    key = jax.random.PRNGKey(0)
    kx, kw, kb = jax.random.split(key, 3)

    N, H, W = 2, 16, 16
    x = jax.random.normal(kx, (N, CIN, H, W), dtype=jnp.float32)
    # Deterministic "PyTorch-like" init (uniform, fan-in based scale).
    fan_in = CIN * K * K
    bound = 1.0 / jnp.sqrt(fan_in)
    weight_t = jax.random.uniform(kw, (CIN, COUT, K, K), jnp.float32,
                                  -bound, bound)
    bias = jax.random.uniform(kb, (COUT,), jnp.float32, -bound, bound)

    out = jax.block_until_ready(decoder_forward(x, weight_t, bias))
    ref = jax.block_until_ready(_reference(x, weight_t, bias))

    assert out.shape == (N, COUT, H, W)
    assert jnp.allclose(out, ref, atol=1e-4, rtol=1e-4)

    print("KERNEL_OK")
</pallas_src>

<mosaic_0001>
module attributes {stable_mosaic.version = 11 : i64} {
  func.func @kernel(%arg0: i32, %arg1: memref<1x32x256xf32, #tpu.memory_space<vmem>>, %arg2: memref<5x32x160xf32, #tpu.memory_space<vmem>>, %arg3: memref<32x1xf32, #tpu.memory_space<vmem>>, %arg4: memref<1x32x256xf32, #tpu.memory_space<vmem>>, %arg5: memref<32x512xf32, #tpu.memory_space<vmem>>, %arg6: memref<160x256xf32, #tpu.memory_space<vmem>>) attributes {dimension_semantics = [#tpu.dimension_semantics<parallel>], iteration_bounds = array<i64: 2>, scalar_prefetch = 0 : i64, scratch_operands = 2 : i64, tpu.core_type = #tpu.core_type<tc>, window_params = [{transform_indices = @transform_0, window_bounds = array<i64: 1, 32, 256>}, {pipeline_mode = #tpu.pipeline_mode<synchronous>, transform_indices = @transform_1, window_bounds = array<i64: 5, 32, 160>}, {pipeline_mode = #tpu.pipeline_mode<synchronous>, transform_indices = @transform_2, window_bounds = array<i64: 32, 1>}, {transform_indices = @transform_3, window_bounds = array<i64: 1, 32, 256>}]} {
    %cst = arith.constant 0.000000e+00 : f32
    %0 = vector.broadcast %cst : f32 to vector<32x512xf32>
    %c0 = arith.constant 0 : index
    %c0_0 = arith.constant 0 : index
    %1 = vector.load %arg5[%c0, %c0_0] : memref<32x512xf32, #tpu.memory_space<vmem>>, vector<32x512xf32>
    tpu.vector_store %arg5[%c0, %c0_0], %0 {strides = array<i32>} : memref<32x512xf32, #tpu.memory_space<vmem>>, vector<32x512xf32>,
    %c0_1 = arith.constant 0 : index
    %c0_2 = arith.constant 0 : index
    %c0_3 = arith.constant 0 : index
    %2 = vector.load %arg1[%c0_1, %c0_2, %c0_3] : memref<1x32x256xf32, #tpu.memory_space<vmem>>, vector<1x32x256xf32>
    %3 = vector.shape_cast %2 : vector<1x32x256xf32> to vector<32x256xf32>
    %c0_4 = arith.constant 0 : index
    %c128 = arith.constant 128 : index
    %4 = vector.load %arg5[%c0_4, %c128] : memref<32x512xf32, #tpu.memory_space<vmem>>, vector<32x256xf32>
    tpu.vector_store %arg5[%c0_4, %c128], %3 {strides = array<i32>} : memref<32x512xf32, #tpu.memory_space<vmem>>, vector<32x256xf32>,
    %5 = tpu.iota {dimensions = array<i32: 1>} : vector<32x256xi32>
    %c16_i32 = arith.constant 16 : i32
    %c0_i32 = arith.constant 0 : i32
    %6 = arith.cmpi eq, %c16_i32, %c0_i32 : i32
    %c1_i32 = arith.constant 1 : i32
    %7 = arith.select %6, %c1_i32, %c16_i32 : i32
    %8 = vector.broadcast %7 : i32 to vector<32x256xi32>
    %9 = arith.remsi %5, %8 : vector<32x256xi32>
    %c0_i32_5 = arith.constant 0 : i32
    %10 = vector.broadcast %c0_i32_5 : i32 to vector<32x256xi32>
    %11 = arith.cmpi ne, %9, %10 : vector<32x256xi32>
    %c0_i32_6 = arith.constant 0 : i32
    %12 = vector.broadcast %c0_i32_6 : i32 to vector<32x256xi32>
    %13 = arith.cmpi slt, %9, %12 : vector<32x256xi32>
    %c0_i32_7 = arith.constant 0 : i32
    %14 = arith.cmpi slt, %7, %c0_i32_7 : i32
    %15 = vector.broadcast %14 : i1 to vector<32x256xi1>
    %16 = vector.broadcast %15 : vector<32x256xi1> to vector<32x256xi1>
    %17 = arith.xori %13, %16 : vector<32x256xi1>
    %18 = arith.andi %17, %11 : vector<32x256xi1>
    %19 = vector.broadcast %7 : i32 to vector<32x256xi32>
    %20 = arith.addi %9, %19 : vector<32x256xi32>
    %21 = arith.select %18, %20, %9 : vector<32x256xi1>, vector<32x256xi32>
    %c0_i32_8 = arith.constant 0 : i32
    %22 = vector.broadcast %c0_i32_8 : i32 to vector<32x256xi32>
    %23 = arith.addi %21, %22 : vector<32x256xi32>
    %c2_i32 = arith.constant 2 : i32
    %24 = vector.broadcast %c2_i32 : i32 to vector<32x256xi32>
    %25 = arith.cmpi sge, %23, %24 : vector<32x256xi32>
    %c0_i32_9 = arith.constant 0 : i32
    %26 = vector.broadcast %c0_i32_9 : i32 to vector<32x256xi32>
    %27 = arith.addi %21, %26 : vector<32x256xi32>
    %c18_i32 = arith.constant 18 : i32
    %28 = vector.broadcast %c18_i32 : i32 to vector<32x256xi32>
    %29 = arith.cmpi slt, %27, %28 : vector<32x256xi32>
    %30 = arith.andi %25, %29 : vector<32x256xi1>
    %c1_i32_10 = arith.constant 1 : i32
    %31 = vector.broadcast %c1_i32_10 : i32 to vector<32x256xi32>
    %32 = arith.addi %21, %31 : vector<32x256xi32>
    %c2_i32_11 = arith.constant 2 : i32
    %33 = vector.broadcast %c2_i32_11 : i32 to vector<32x256xi32>
    %34 = arith.cmpi sge, %32, %33 : vector<32x256xi32>
    %c1_i32_12 = arith.constant 1 : i32
    %35 = vector.broadcast %c1_i32_12 : i32 to vector<32x256xi32>
    %36 = arith.addi %21, %35 : vector<32x256xi32>
    %c18_i32_13 = arith.constant 18 : i32
    %37 = vector.broadcast %c18_i32_13 : i32 to vector<32x256xi32>
    %38 = arith.cmpi slt, %36, %37 : vector<32x256xi32>
    %39 = arith.andi %34, %38 : vector<32x256xi1>
    %c3_i32 = arith.constant 3 : i32
    %40 = vector.broadcast %c3_i32 : i32 to vector<32x256xi32>
    %41 = arith.addi %21, %40 : vector<32x256xi32>
    %c2_i32_14 = arith.constant 2 : i32
    %42 = vector.broadcast %c2_i32_14 : i32 to vector<32x256xi32>
    %43 = arith.cmpi sge, %41, %42 : vector<32x256xi32>
    %c3_i32_15 = arith.constant 3 : i32
    %44 = vector.broadcast %c3_i32_15 : i32 to vector<32x256xi32>
    %45 = arith.addi %21, %44 : vector<32x256xi32>
    %c18_i32_16 = arith.constant 18 : i32
    %46 = vector.broadcast %c18_i32_16 : i32 to vector<32x256xi32>
    %47 = arith.cmpi slt, %45, %46 : vector<32x256xi32>
    %48 = arith.andi %43, %47 : vector<32x256xi1>
    %c4_i32 = arith.constant 4 : i32
    %49 = vector.broadcast %c4_i32 : i32 to vector<32x256xi32>
    %50 = arith.addi %21, %49 : vector<32x256xi32>
    %c2_i32_17 = arith.constant 2 : i32
    %51 = vector.broadcast %c2_i32_17 : i32 to vector<32x256xi32>
    %52 = arith.cmpi sge, %50, %51 : vector<32x256xi32>
    %c4_i32_18 = arith.constant 4 : i32
    %53 = vector.broadcast %c4_i32_18 : i32 to vector<32x256xi32>
    %54 = arith.addi %21, %53 : vector<32x256xi32>
    %c18_i32_19 = arith.constant 18 : i32
    %55 = vector.broadcast %c18_i32_19 : i32 to vector<32x256xi32>
    %56 = arith.cmpi slt, %54, %55 : vector<32x256xi32>
    %57 = arith.andi %52, %56 : vector<32x256xi1>
    %cst_20 = arith.constant 0.000000e+00 : f32
    %58 = vector.broadcast %cst_20 : f32 to vector<32x256xf32>
    %c0_21 = arith.constant 0 : index
    %c94 = arith.constant 94 : index
    %59 = vector.load %arg5[%c0_21, %c94] : memref<32x512xf32, #tpu.memory_space<vmem>>, vector<32x256xf32>
    %cst_22 = arith.constant 0.000000e+00 : f32
    %60 = vector.broadcast %cst_22 : f32 to vector<32x256xf32>
    %61 = arith.select %30, %59, %60 : vector<32x256xi1>, vector<32x256xf32>
    %c0_23 = arith.constant 0 : index
    %c0_24 = arith.constant 0 : index
    %62 = vector.load %arg6[%c0_23, %c0_24] : memref<160x256xf32, #tpu.memory_space<vmem>>, vector<32x256xf32>
    tpu.vector_store %arg6[%c0_23, %c0_24], %61 {strides = array<i32>} : memref<160x256xf32, #tpu.memory_space<vmem>>, vector<32x256xf32>,
    %c0_25 = arith.constant 0 : index
    %c95 = arith.constant 95 : index
    %63 = vector.load %arg5[%c0_25, %c95] : memref<32x512xf32, #tpu.memory_space<vmem>>, vector<32x256xf32>
    %cst_26 = arith.constant 0.000000e+00 : f32
    %64 = vector.broadcast %cst_26 : f32 to vector<32x256xf32>
    %65 = arith.select %39, %63, %64 : vector<32x256xi1>, vector<32x256xf32>
    %c32 = arith.constant 32 : index
    %c0_27 = arith.constant 0 : index
    %66 = vector.load %arg6[%c32, %c0_27] : memref<160x256xf32, #tpu.memory_space<vmem>>, vector<32x256xf32>
    tpu.vector_store %arg6[%c32, %c0_27], %65 {strides = array<i32>} : memref<160x256xf32, #tpu.memory_space<vmem>>, vector<32x256xf32>,
    %c0_28 = arith.constant 0 : index
    %c96 = arith.constant 96 : index
    %67 = vector.load %arg5[%c0_28, %c96] : memref<32x512xf32, #tpu.memory_space<vmem>>, vector<32x256xf32>
    %c64 = arith.constant 64 : index
    %c0_29 = arith.constant 0 : index
    %68 = vector.load %arg6[%c64, %c0_29] : memref<160x256xf32, #tpu.memory_space<vmem>>, vector<32x256xf32>
    tpu.vector_store %arg6[%c64, %c0_29], %67 {strides = array<i32>} : memref<160x256xf32, #tpu.memory_space<vmem>>, vector<32x256xf32>,
    %c0_30 = arith.constant 0 : index
    %c97 = arith.constant 97 : index
    %69 = vector.load %arg5[%c0_30, %c97] : memref<32x512xf32, #tpu.memory_space<vmem>>, vector<32x256xf32>
    %cst_31 = arith.constant 0.000000e+00 : f32
    %70 = vector.broadcast %cst_31 : f32 to vector<32x256xf32>
    %71 = arith.select %48, %69, %70 : vector<32x256xi1>, vector<32x256xf32>
    %c96_32 = arith.constant 96 : index
    %c0_33 = arith.constant 0 : index
    %72 = vector.load %arg6[%c96_32, %c0_33] : memref<160x256xf32, #tpu.memory_space<vmem>>, vector<32x256xf32>
    tpu.vector_store %arg6[%c96_32, %c0_33], %71 {strides = array<i32>} : memref<160x256xf32, #tpu.memory_space<vmem>>, vector<32x256xf32>,
    %c0_34 = arith.constant 0 : index
    %c98 = arith.constant 98 : index
    %73 = vector.load %arg5[%c0_34, %c98] : memref<32x512xf32, #tpu.memory_space<vmem>>, vector<32x256xf32>
    %cst_35 = arith.constant 0.000000e+00 : f32
    %74 = vector.broadcast %cst_35 : f32 to vector<32x256xf32>
    %75 = arith.select %57, %73, %74 : vector<32x256xi1>, vector<32x256xf32>
    %c128_36 = arith.constant 128 : index
    %c0_37 = arith.constant 0 : index
    %76 = vector.load %arg6[%c128_36, %c0_37] : memref<160x256xf32, #tpu.memory_space<vmem>>, vector<32x256xf32>
    tpu.vector_store %arg6[%c128_36, %c0_37], %75 {strides = array<i32>} : memref<160x256xf32, #tpu.memory_space<vmem>>, vector<32x256xf32>,
    %c0_38 = arith.constant 0 : index
    %c0_39 = arith.constant 0 : index
    %c0_40 = arith.constant 0 : index
    %77 = vector.load %arg2[%c0_38, %c0_39, %c0_40] : memref<5x32x160xf32, #tpu.memory_space<vmem>>, vector<1x32x160xf32>
    %78 = vector.shape_cast %77 : vector<1x32x160xf32> to vector<32x160xf32>
    %c0_41 = arith.constant 0 : index
    %c0_42 = arith.constant 0 : index
    %79 = vector.load %arg6[%c0_41, %c0_42] : memref<160x256xf32, #tpu.memory_space<vmem>>, vector<160x256xf32>
    %cst_43 = arith.constant dense<0.000000e+00> : vector<32x256xf32>
    %80 = tpu.matmul %78, %79, %cst_43 {dimension_numbers = #tpu.dot_dimension_numbers<[1], [0], [0], [1], [0, 0, 1, 1], [], []>} : vector<32x160xf32>, vector<160x256xf32>, vector<32x256xf32> -> vector<32x256xf32>
    %81 = arith.addf %58, %80 : vector<32x256xf32>
    %c0_44 = arith.constant 0 : index
    %c110 = arith.constant 110 : index
    %82 = vector.load %arg5[%c0_44, %c110] : memref<32x512xf32, #tpu.memory_space<vmem>>, vector<32x256xf32>
    %cst_45 = arith.constant 0.000000e+00 : f32
    %83 = vector.broadcast %cst_45 : f32 to vector<32x256xf32>
    %84 = arith.select %30, %82, %83 : vector<32x256xi1>, vector<32x256xf32>
    %c0_46 = arith.constant 0 : index
    %c0_47 = arith.constant 0 : index
    %85 = vector.load %arg6[%c0_46, %c0_47] : memref<160x256xf32, #tpu.memory_space<vmem>>, vector<32x256xf32>
    tpu.vector_store %arg6[%c0_46, %c0_47], %84 {strides = array<i32>} : memref<160x256xf32, #tpu.memory_space<vmem>>, vector<32x256xf32>,
    %c0_48 = arith.constant 0 : index
    %c111 = arith.constant 111 : index
    %86 = vector.load %arg5[%c0_48, %c111] : memref<32x512xf32, #tpu.memory_space<vmem>>, vector<32x256xf32>
    %cst_49 = arith.constant 0.000000e+00 : f32
    %87 = vector.broadcast %cst_49 : f32 to vector<32x256xf32>
    %88 = arith.select %39, %86, %87 : vector<32x256xi1>, vector<32x256xf32>
    %c32_50 = arith.constant 32 : index
    %c0_51 = arith.constant 0 : index
    %89 = vector.load %arg6[%c32_50, %c0_51] : memref<160x256xf32, #tpu.memory_space<vmem>>, vector<32x256xf32>
    tpu.vector_store %arg6[%c32_50, %c0_51], %88 {strides = array<i32>} : memref<160x256xf32, #tpu.memory_space<vmem>>, vector<32x256xf32>,
    %c0_52 = arith.constant 0 : index
    %c112 = arith.constant 112 : index
    %90 = vector.load %arg5[%c0_52, %c112] : memref<32x512xf32, #tpu.memory_space<vmem>>, vector<32x256xf32>
    %c64_53 = arith.constant 64 : index
    %c0_54 = arith.constant 0 : index
    %91 = vector.load %arg6[%c64_53, %c0_54] : memref<160x256xf32, #tpu.memory_space<vmem>>, vector<32x256xf32>
    tpu.vector_store %arg6[%c64_53, %c0_54], %90 {strides = array<i32>} : memref<160x256xf32, #tpu.memory_space<vmem>>, vector<32x256xf32>,
    %c0_55 = arith.constant 0 : index
    %c113 = arith.constant 113 : index
    %92 = vector.load %arg5[%c0_55, %c113] : memref<32x512xf32, #tpu.memory_space<vmem>>, vector<32x256xf32>
    %cst_56 = arith.constant 0.000000e+00 : f32
    %93 = vector.broadcast %cst_56 : f32 to vector<32x256xf32>
    %94 = arith.select %48, %92, %93 : vector<32x256xi1>, vector<32x256xf32>
    %c96_57 = arith.constant 96 : index
    %c0_58 = arith.constant 0 : index
    %95 = vector.load %arg6[%c96_57, %c0_58] : memref<160x256xf32, #tpu.memory_space<vmem>>, vector<32x256xf32>
    tpu.vector_store %arg6[%c96_57, %c0_58], %94 {strides = array<i32>} : memref<160x256xf32, #tpu.memory_space<vmem>>, vector<32x256xf32>,
    %c0_59 = arith.constant 0 : index
    %c114 = arith.constant 114 : index
    %96 = vector.load %arg5[%c0_59, %c114] : memref<32x512xf32, #tpu.memory_space<vmem>>, vector<32x256xf32>
    %cst_60 = arith.constant 0.000000e+00 : f32
    %97 = vector.broadcast %cst_60 : f32 to vector<32x256xf32>
    %98 = arith.select %57, %96, %97 : vector<32x256xi1>, vector<32x256xf32>
    %c128_61 = arith.constant 128 : index
    %c0_62 = arith.constant 0 : index
    %99 = vector.load %arg6[%c128_61, %c0_62] : memref<160x256xf32, #tpu.memory_space<vmem>>, vector<32x256xf32>
    tpu.vector_store %arg6[%c128_61, %c0_62], %98 {strides = array<i32>} : memref<160x256xf32, #tpu.memory_space<vmem>>, vector<32x256xf32>,
    %c1 = arith.constant 1 : index
    %c0_63 = arith.constant 0 : index
    %c0_64 = arith.constant 0 : index
    %100 = vector.load %arg2[%c1, %c0_63, %c0_64] : memref<5x32x160xf32, #tpu.memory_space<vmem>>, vector<1x32x160xf32>
    %101 = vector.shape_cast %100 : vector<1x32x160xf32> to vector<32x160xf32>
    %c0_65 = arith.constant 0 : index
    %c0_66 = arith.constant 0 : index
    %102 = vector.load %arg6[%c0_65, %c0_66] : memref<160x256xf32, #tpu.memory_space<vmem>>, vector<160x256xf32>
    %cst_67 = arith.constant dense<0.000000e+00> : vector<32x256xf32>
    %103 = tpu.matmul %101, %102, %cst_67 {dimension_numbers = #tpu.dot_dimension_numbers<[1], [0], [0], [1], [0, 0, 1, 1], [], []>} : vector<32x160xf32>, vector<160x256xf32>, vector<32x256xf32> -> vector<32x256xf32>
    %104 = arith.addf %81, %103 : vector<32x256xf32>
    %c0_68 = arith.constant 0 : index
    %c126 = arith.constant 126 : index
    %105 = vector.load %arg5[%c0_68, %c126] : memref<32x512xf32, #tpu.memory_space<vmem>>, vector<32x256xf32>
    %cst_69 = arith.constant 0.000000e+00 : f32
    %106 = vector.broadcast %cst_69 : f32 to vector<32x256xf32>
    %107 = arith.select %30, %105, %106 : vector<32x256xi1>, vector<32x256xf32>
    %c0_70 = arith.constant 0 : index
    %c0_71 = arith.constant 0 : index
    %108 = vector.load %arg6[%c0_70, %c0_71] : memref<160x256xf32, #tpu.memory_space<vmem>>, vector<32x256xf32>
    tpu.vector_store %arg6[%c0_70, %c0_71], %107 {strides = array<i32>} : memref<160x256xf32, #tpu.memory_space<vmem>>, vector<32x256xf32>,
    %c0_72 = arith.constant 0 : index
    %c127 = arith.constant 127 : index
    %109 = vector.load %arg5[%c0_72, %c127] : memref<32x512xf32, #tpu.memory_space<vmem>>, vector<32x256xf32>
    %cst_73 = arith.constant 0.000000e+00 : f32
    %110 = vector.broadcast %cst_73 : f32 to vector<32x256xf32>
    %111 = arith.select %39, %109, %110 : vector<32x256xi1>, vector<32x256xf32>
    %c32_74 = arith.constant 32 : index
    %c0_75 = arith.constant 0 : index
    %112 = vector.load %arg6[%c32_74, %c0_75] : memref<160x256xf32, #tpu.memory_space<vmem>>, vector<32x256xf32>
    tpu.vector_store %arg6[%c32_74, %c0_75], %111 {strides = array<i32>} : memref<160x256xf32, #tpu.memory_space<vmem>>, vector<32x256xf32>,
    %c0_76 = arith.constant 0 : index
    %c128_77 = arith.constant 128 : index
    %113 = vector.load %arg5[%c0_76, %c128_77] : memref<32x512xf32, #tpu.memory_space<vmem>>, vector<32x256xf32>
    %c64_78 = arith.constant 64 : index
    %c0_79 = arith.constant 0 : index
    %114 = vector.load %arg6[%c64_78, %c0_79] : memref<160x256xf32, #tpu.memory_space<vmem>>, vector<32x256xf32>
    tpu.vector_store %arg6[%c64_78, %c0_79], %113 {strides = array<i32>} : memref<160x256xf32, #tpu.memory_space<vmem>>, vector<32x256xf32>,
    %c0_80 = arith.constant 0 : index
    %c129 = arith.constant 129 : index
    %115 = vector.load %arg5[%c0_80, %c129] : memref<32x512xf32, #tpu.memory_space<vmem>>, vector<32x256xf32>
    %cst_81 = arith.constant 0.000000e+00 : f32
    %116 = vector.broadcast %cst_81 : f32 to vector<32x256xf32>
    %117 = arith.select %48, %115, %116 : vector<32x256xi1>, vector<32x256xf32>
    %c96_82 = arith.constant 96 : index
    %c0_83 = arith.constant 0 : index
    %118 = vector.load %arg6[%c96_82, %c0_83] : memref<160x256xf32, #tpu.memory_space<vmem>>, vector<32x256xf32>
    tpu.vector_store %arg6[%c96_82, %c0_83], %117 {strides = array<i32>} : memref<160x256xf32, #tpu.memory_space<vmem>>, vector<32x256xf32>,
    %c0_84 = arith.constant 0 : index
    %c130 = arith.constant 130 : index
    %119 = vector.load %arg5[%c0_84, %c130] : memref<32x512xf32, #tpu.memory_space<vmem>>, vector<32x256xf32>
    %cst_85 = arith.constant 0.000000e+00 : f32
    %120 = vector.broadcast %cst_85 : f32 to vector<32x256xf32>
    %121 = arith.select %57, %119, %120 : vector<32x256xi1>, vector<32x256xf32>
    %c128_86 = arith.constant 128 : index
    %c0_87 = arith.constant 0 : index
    %122 = vector.load %arg6[%c128_86, %c0_87] : memref<160x256xf32, #tpu.memory_space<vmem>>, vector<32x256xf32>
    tpu.vector_store %arg6[%c128_86, %c0_87], %121 {strides = array<i32>} : memref<160x256xf32, #tpu.memory_space<vmem>>, vector<32x256xf32>,
    %c2 = arith.constant 2 : index
    %c0_88 = arith.constant 0 : index
    %c0_89 = arith.constant 0 : index
    %123 = vector.load %arg2[%c2, %c0_88, %c0_89] : memref<5x32x160xf32, #tpu.memory_space<vmem>>, vector<1x32x160xf32>
    %124 = vector.shape_cast %123 : vector<1x32x160xf32> to vector<32x160xf32>
    %c0_90 = arith.constant 0 : index
    %c0_91 = arith.constant 0 : index
    %125 = vector.load %arg6[%c0_90, %c0_91] : memref<160x256xf32, #tpu.memory_space<vmem>>, vector<160x256xf32>
    %cst_92 = arith.constant dense<0.000000e+00> : vector<32x256xf32>
    %126 = tpu.matmul %124, %125, %cst_92 {dimension_numbers = #tpu.dot_dimension_numbers<[1], [0], [0], [1], [0, 0, 1, 1], [], []>} : vector<32x160xf32>, vector<160x256xf32>, vector<32x256xf32> -> vector<32x256xf32>
    %127 = arith.addf %104, %126 : vector<32x256xf32>
    %c0_93 = arith.constant 0 : index
    %c142 = arith.constant 142 : index
    %128 = vector.load %arg5[%c0_93, %c142] : memref<32x512xf32, #tpu.memory_space<vmem>>, vector<32x256xf32>
    %cst_94 = arith.constant 0.000000e+00 : f32
    %129 = vector.broadcast %cst_94 : f32 to vector<32x256xf32>
    %130 = arith.select %30, %128, %129 : vector<32x256xi1>, vector<32x256xf32>
    %c0_95 = arith.constant 0 : index
    %c0_96 = arith.constant 0 : index
    %131 = vector.load %arg6[%c0_95, %c0_96] : memref<160x256xf32, #tpu.memory_space<vmem>>, vector<32x256xf32>
    tpu.vector_store %arg6[%c0_95, %c0_96], %130 {strides = array<i32>} : memref<160x256xf32, #tpu.memory_space<vmem>>, vector<32x256xf32>,
    %c0_97 = arith.constant 0 : index
    %c143 = arith.constant 143 : index
    %132 = vector.load %arg5[%c0_97, %c143] : memref<32x512xf32, #tpu.memory_space<vmem>>, vector<32x256xf32>
    %cst_98 = arith.constant 0.000000e+00 : f32
    %133 = vector.broadcast %cst_98 : f32 to vector<32x256xf32>
    %134 = arith.select %39, %132, %133 : vector<32x256xi1>, vector<32x256xf32>
    %c32_99 = arith.constant 32 : index
    %c0_100 = arith.constant 0 : index
    %135 = vector.load %arg6[%c32_99, %c0_100] : memref<160x256xf32, #tpu.memory_space<vmem>>, vector<32x256xf32>
    tpu.vector_store %arg6[%c32_99, %c0_100], %134 {strides = array<i32>} : memref<160x256xf32, #tpu.memory_space<vmem>>, vector<32x256xf32>,
    %c0_101 = arith.constant 0 : index
    %c144 = arith.constant 144 : index
    %136 = vector.load %arg5[%c0_101, %c144] : memref<32x512xf32, #tpu.memory_space<vmem>>, vector<32x256xf32>
    %c64_102 = arith.constant 64 : index
    %c0_103 = arith.constant 0 : index
    %137 = vector.load %arg6[%c64_102, %c0_103] : memref<160x256xf32, #tpu.memory_space<vmem>>, vector<32x256xf32>
    tpu.vector_store %arg6[%c64_102, %c0_103], %136 {strides = array<i32>} : memref<160x256xf32, #tpu.memory_space<vmem>>, vector<32x256xf32>,
    %c0_104 = arith.constant 0 : index
    %c145 = arith.constant 145 : index
    %138 = vector.load %arg5[%c0_104, %c145] : memref<32x512xf32, #tpu.memory_space<vmem>>, vector<32x256xf32>
    %cst_105 = arith.constant 0.000000e+00 : f32
    %139 = vector.broadcast %cst_105 : f32 to vector<32x256xf32>
    %140 = arith.select %48, %138, %139 : vector<32x256xi1>, vector<32x256xf32>
    %c96_106 = arith.constant 96 : index
    %c0_107 = arith.constant 0 : index
    %141 = vector.load %arg6[%c96_106, %c0_107] : memref<160x256xf32, #tpu.memory_space<vmem>>, vector<32x256xf32>
    tpu.vector_store %arg6[%c96_106, %c0_107], %140 {strides = array<i32>} : memref<160x256xf32, #tpu.memory_space<vmem>>, vector<32x256xf32>,
    %c0_108 = arith.constant 0 : index
    %c146 = arith.constant 146 : index
    %142 = vector.load %arg5[%c0_108, %c146] : memref<32x512xf32, #tpu.memory_space<vmem>>, vector<32x256xf32>
    %cst_109 = arith.constant 0.000000e+00 : f32
    %143 = vector.broadcast %cst_109 : f32 to vector<32x256xf32>
    %144 = arith.select %57, %142, %143 : vector<32x256xi1>, vector<32x256xf32>
    %c128_110 = arith.constant 128 : index
    %c0_111 = arith.constant 0 : index
    %145 = vector.load %arg6[%c128_110, %c0_111] : memref<160x256xf32, #tpu.memory_space<vmem>>, vector<32x256xf32>
    tpu.vector_store %arg6[%c128_110, %c0_111], %144 {strides = array<i32>} : memref<160x256xf32, #tpu.memory_space<vmem>>, vector<32x256xf32>,
    %c3 = arith.constant 3 : index
    %c0_112 = arith.constant 0 : index
    %c0_113 = arith.constant 0 : index
    %146 = vector.load %arg2[%c3, %c0_112, %c0_113] : memref<5x32x160xf32, #tpu.memory_space<vmem>>, vector<1x32x160xf32>
    %147 = vector.shape_cast %146 : vector<1x32x160xf32> to vector<32x160xf32>
    %c0_114 = arith.constant 0 : index
    %c0_115 = arith.constant 0 : index
    %148 = vector.load %arg6[%c0_114, %c0_115] : memref<160x256xf32, #tpu.memory_space<vmem>>, vector<160x256xf32>
    %cst_116 = arith.constant dense<0.000000e+00> : vector<32x256xf32>
    %149 = tpu.matmul %147, %148, %cst_116 {dimension_numbers = #tpu.dot_dimension_numbers<[1], [0], [0], [1], [0, 0, 1, 1], [], []>} : vector<32x160xf32>, vector<160x256xf32>, vector<32x256xf32> -> vector<32x256xf32>
    %150 = arith.addf %127, %149 : vector<32x256xf32>
    %c0_117 = arith.constant 0 : index
    %c158 = arith.constant 158 : index
    %151 = vector.load %arg5[%c0_117, %c158] : memref<32x512xf32, #tpu.memory_space<vmem>>, vector<32x256xf32>
    %cst_118 = arith.constant 0.000000e+00 : f32
    %152 = vector.broadcast %cst_118 : f32 to vector<32x256xf32>
    %153 = arith.select %30, %151, %152 : vector<32x256xi1>, vector<32x256xf32>
    %c0_119 = arith.constant 0 : index
    %c0_120 = arith.constant 0 : index
    %154 = vector.load %arg6[%c0_119, %c0_120] : memref<160x256xf32, #tpu.memory_space<vmem>>, vector<32x256xf32>
    tpu.vector_store %arg6[%c0_119, %c0_120], %153 {strides = array<i32>} : memref<160x256xf32, #tpu.memory_space<vmem>>, vector<32x256xf32>,
    %c0_121 = arith.constant 0 : index
    %c159 = arith.constant 159 : index
    %155 = vector.load %arg5[%c0_121, %c159] : memref<32x512xf32, #tpu.memory_space<vmem>>, vector<32x256xf32>
    %cst_122 = arith.constant 0.000000e+00 : f32
    %156 = vector.broadcast %cst_122 : f32 to vector<32x256xf32>
    %157 = arith.select %39, %155, %156 : vector<32x256xi1>, vector<32x256xf32>
    %c32_123 = arith.constant 32 : index
    %c0_124 = arith.constant 0 : index
    %158 = vector.load %arg6[%c32_123, %c0_124] : memref<160x256xf32, #tpu.memory_space<vmem>>, vector<32x256xf32>
    tpu.vector_store %arg6[%c32_123, %c0_124], %157 {strides = array<i32>} : memref<160x256xf32, #tpu.memory_space<vmem>>, vector<32x256xf32>,
    %c0_125 = arith.constant 0 : index
    %c160 = arith.constant 160 : index
    %159 = vector.load %arg5[%c0_125, %c160] : memref<32x512xf32, #tpu.memory_space<vmem>>, vector<32x256xf32>
    %c64_126 = arith.constant 64 : index
    %c0_127 = arith.constant 0 : index
    %160 = vector.load %arg6[%c64_126, %c0_127] : memref<160x256xf32, #tpu.memory_space<vmem>>, vector<32x256xf32>
    tpu.vector_store %arg6[%c64_126, %c0_127], %159 {strides = array<i32>} : memref<160x256xf32, #tpu.memory_space<vmem>>, vector<32x256xf32>,
    %c0_128 = arith.constant 0 : index
    %c161 = arith.constant 161 : index
    %161 = vector.load %arg5[%c0_128, %c161] : memref<32x512xf32, #tpu.memory_space<vmem>>, vector<32x256xf32>
    %cst_129 = arith.constant 0.000000e+00 : f32
    %162 = vector.broadcast %cst_129 : f32 to vector<32x256xf32>
    %163 = arith.select %48, %161, %162 : vector<32x256xi1>, vector<32x256xf32>
    %c96_130 = arith.constant 96 : index
    %c0_131 = arith.constant 0 : index
    %164 = vector.load %arg6[%c96_130, %c0_131] : memref<160x256xf32, #tpu.memory_space<vmem>>, vector<32x256xf32>
    tpu.vector_store %arg6[%c96_130, %c0_131], %163 {strides = array<i32>} : memref<160x256xf32, #tpu.memory_space<vmem>>, vector<32x256xf32>,
    %c0_132 = arith.constant 0 : index
    %c162 = arith.constant 162 : index
    %165 = vector.load %arg5[%c0_132, %c162] : memref<32x512xf32, #tpu.memory_space<vmem>>, vector<32x256xf32>
    %cst_133 = arith.constant 0.000000e+00 : f32
    %166 = vector.broadcast %cst_133 : f32 to vector<32x256xf32>
    %167 = arith.select %57, %165, %166 : vector<32x256xi1>, vector<32x256xf32>
    %c128_134 = arith.constant 128 : index
    %c0_135 = arith.constant 0 : index
    %168 = vector.load %arg6[%c128_134, %c0_135] : memref<160x256xf32, #tpu.memory_space<vmem>>, vector<32x256xf32>
    tpu.vector_store %arg6[%c128_134, %c0_135], %167 {strides = array<i32>} : memref<160x256xf32, #tpu.memory_space<vmem>>, vector<32x256xf32>,
    %c4 = arith.constant 4 : index
    %c0_136 = arith.constant 0 : index
    %c0_137 = arith.constant 0 : index
    %169 = vector.load %arg2[%c4, %c0_136, %c0_137] : memref<5x32x160xf32, #tpu.memory_space<vmem>>, vector<1x32x160xf32>
    %170 = vector.shape_cast %169 : vector<1x32x160xf32> to vector<32x160xf32>
    %c0_138 = arith.constant 0 : index
    %c0_139 = arith.constant 0 : index
    %171 = vector.load %arg6[%c0_138, %c0_139] : memref<160x256xf32, #tpu.memory_space<vmem>>, vector<160x256xf32>
    %cst_140 = arith.constant dense<0.000000e+00> : vector<32x256xf32>
    %172 = tpu.matmul %170, %171, %cst_140 {dimension_numbers = #tpu.dot_dimension_numbers<[1], [0], [0], [1], [0, 0, 1, 1], [], []>} : vector<32x160xf32>, vector<160x256xf32>, vector<32x256xf32> -> vector<32x256xf32>
    %173 = arith.addf %150, %172 : vector<32x256xf32>
    %c0_141 = arith.constant 0 : index
    %c0_142 = arith.constant 0 : index
    %174 = vector.load %arg3[%c0_141, %c0_142] : memref<32x1xf32, #tpu.memory_space<vmem>>, vector<32x1xf32>
    %175 = vector.broadcast %174 : vector<32x1xf32> to vector<32x256xf32>
    %176 = arith.addf %173, %175 : vector<32x256xf32>
    %c0_143 = arith.constant 0 : index
    %c0_144 = arith.constant 0 : index
    %c0_145 = arith.constant 0 : index
    %177 = vector.load %arg4[%c0_143, %c0_144, %c0_145] : memref<1x32x256xf32, #tpu.memory_space<vmem>>, vector<1x32x256xf32>
    %178 = vector.shape_cast %177 : vector<1x32x256xf32> to vector<32x256xf32>
    %179 = vector.shape_cast %176 : vector<32x256xf32> to vector<1x32x256xf32>
    tpu.vector_store %arg4[%c0_143, %c0_144, %c0_145], %179 {strides = array<i32>} : memref<1x32x256xf32, #tpu.memory_space<vmem>>, vector<1x32x256xf32>,
    return
  }
  func.func @transform_0(%arg0: i32) -> (i32, i32, i32) {
    %c0_i32 = arith.constant 0 : i32
    %c0_i32_0 = arith.constant 0 : i32
    %c0_i32_1 = arith.constant 0 : i32
    return %arg0, %c0_i32, %c0_i32_0 : i32, i32, i32
  }
  func.func @transform_1(%arg0: i32) -> (i32, i32, i32) {
    %c0_i32 = arith.constant 0 : i32
    %c0_i32_0 = arith.constant 0 : i32
    %c0_i32_1 = arith.constant 0 : i32
    %c0_i32_2 = arith.constant 0 : i32
    return %c0_i32, %c0_i32_0, %c0_i32_1 : i32, i32, i32
  }
  func.func @transform_2(%arg0: i32) -> (i32, i32) {
    %c0_i32 = arith.constant 0 : i32
    %c0_i32_0 = arith.constant 0 : i32
    %c0_i32_1 = arith.constant 0 : i32
    return %c0_i32, %c0_i32_0 : i32, i32
  }
  func.func @transform_3(%arg0: i32) -> (i32, i32, i32) {
    %c0_i32 = arith.constant 0 : i32
    %c0_i32_0 = arith.constant 0 : i32
    %c0_i32_1 = arith.constant 0 : i32
    return %arg0, %c0_i32, %c0_i32_0 : i32, i32, i32
  }
}

</mosaic_0001>

<bundles_post_ra>
// kernel: decoder_forward.1
= control target key start
LH: loop header
LB: loop body
LE: loop exit
PB: predicated region body
PF: predicated region fallthrough
CT: control target
= control target key end

     0   :  { %s4431_s12 = smov 0   ;;  %s5564_s0 = inlined_call_operand.vmem [shape: f32[2,32,256], index: 0, kind: input, shape index: {}]   ;;  %s5565_s1 = inlined_call_operand.vmem [shape: f32[5,32,160], index: 1, kind: input, shape index: {}]   ;;  %s5566_s2 = inlined_call_operand.vmem [shape: f32[32,1], index: 2, kind: input, shape index: {}]   ;;  %s5567_s3 = inlined_call_operand.vmem [shape: f32[2,32,256], index: 3, kind: output, shape index: {}]  }
   0x1 LB: > { %s3056_s13 = sadd.s32 4294967295, %s4383_s12   ;;  %p3060_p0 = scmp.ge.s32.totalorder %s4383_s12, 1  ;;  %s4383_s12 = sphi %s4431_s12, %s13_s12  }
   0x2   : > { %p137_p1 = scmp.lt.s32.totalorder %s4383_s12, 3 }
   0x4   : > { %p138_p2 = pnand %p3060_p0, %p137_p1 }
   0x6   : > { %141 = sbr.rel (%p138_p2) target bundleno = 651 (0x28b), region = 32 }
   0xd   : > { %p161_p3 = scmp.lt.s32.totalorder %s3056_s13, 1  ;;  %v5568_v4 = vmov 0.0   ;;  %s4386_s18 = smov 34   ;;  %v3066_v45 = vld [vmem:[%s5565_s1 + $0x48] sm:$0xff]  ;;  %vm470_vm0 = vcmask 261120   ;;  %v203_v48 = vlaneseq  ;;  %vm753_vm1 = vcmask 146432  }
   0xe   : > { %s4387_s19 = smov 33   ;;  %s4388_s20 = smov 32   ;;  %3073 = vmatprep.mubr.msk.f32.mxu1 %vm470_vm0, %v3066_v45  ;;  %v3082_v49 = vld [vmem:[%s5565_s1 + $0x88] sm:$0xff]  ;;  %vm834_vm6 = vcmask 138240   ;;  %vm915_vm11 = vcmask 130048   ;;  %vm1401_vm12 = vcmask 15360  }
   0xf   : > { %s5606_s13 = smov (!%p161_p3, %s3056_s13), 1  ;;  %s4389_s21 = smov 31   ;;  %3089 = vmatprep.mubr.msk.f32.mxu0 %vm470_vm0, %v3082_v49  ;;  %v204_v52 = vand.u32 127, %v203_v48  ;;  %vm1482_vm13 = vcmask 7168   ;;  %vm988_vm14 = vcmask 121856  }
  0x10   : > { %s3119_s14 = sshll.u32 %s5606_s13, 6  ;;  %s4390_s22 = smov 30  }
  0x11   : > { %s4447_s17 = scalar_lea.vmem %s5564_s0, %s3119_s14  ;;  %s4391_s23 = smov 18   ;;  %v205_v55 = vadd.s32 128, %v204_v52  ;;  %v4649_v62 = vand.u32 15, %v204_v52 }
  0x12   : > { %v4450_v0 = vld [vmem:[%s4447_s17 + $0x10] sm:$0xff]  ;;  %v4453_v1 = vld [vmem:[%s4447_s17 + $0x18] sm:$0xff]  ;;  %v4456_v2 = vld [vmem:[%s4447_s17] sm:$0xff]  ;;  %s4392_s24 = smov 17   ;;  %s4393_s25 = smov 16  }
  0x13   : > { %v4460_v3 = vpack.i.bf16 %v4453_v1, %v4450_v0  ;;  %v3647_v5 = vpack.i.bf16 %v4456_v2, %v5568_v4  ;;  %v4465_v6 = vld [vmem:[%s4447_s17 + $0x20] sm:$0xff]  ;;  %v4468_v7 = vld [vmem:[%s4447_s17 + $0x8] sm:$0xff]  ;;  %v4478_v10 = vld [vmem:[%s4447_s17 + $0x30] sm:$0xff]  ;;  %s4394_s26 = smov 2   ;;  %s4395_s27 = smov 1   ;;  %v4548_v21 = vpack.i.bf16 %v5568_v4, %v4453_v1  ;;  %v4558_v24 = vpack.i.bf16 %v4450_v0, %v4456_v2 }
  0x14   : > { %v3662_v8 = vpack.i.bf16 %v4465_v6, %v5568_v4  ;;  %v4475_v9 = vpack.i.bf16 %v5568_v4, %v4468_v7  ;;  %v4481_v11 = vld [vmem:[%s4447_s17 + $0x38] sm:$0xff]  ;;  %v4484_v12 = vld [vmem:[%s4447_s17 + $0x28] sm:$0xff]  ;;  %v3887_v15 = vpack.i.bf16 %v4468_v7, %v4456_v2  ;;  %s4396_s28 = smov 15   ;;  %s4397_s29 = smov 127   ;;  %v4583_v32 = vpack.i.bf16 %v4478_v10, %v4465_v6 }
  0x15   : > { %3658 = vrot.lane.b32.xlu1 %v4460_v3, %s4386_s18  ;;  %3648 = vrot.lane.b32.xlu0 %v3647_v5, %s4386_s18  ;;  %v4489_v13 = vpack.i.bf16 %v4481_v11, %v4478_v10  ;;  %v4493_v14 = vpack.i.bf16 %v5568_v4, %v4484_v12  ;;  %v3902_v16 = vpack.i.bf16 %v4484_v12, %v4465_v6  ;;  %s4398_s30 = smov 14   ;;  %s4399_s4 = smov 126   ;;  %v4645_v58 = vand.u32 15, %v205_v55 }
  0x16   : > { %v4573_v29 = vpack.i.bf16 %v5568_v4, %v4481_v11  ;;  %s4400_s9 = smov 114   ;;  %s4401_s10 = smov 113   ;;  %vm230_vm3 = vcmp.ge.s32.totalorder %v4649_v62, 2 }
  0x17   : > { %vm231_vm2 = vcmp.ge.s32.totalorder %v4645_v58, 2  ;;  %vm4665_vm5 = vmpackc.low %vm230_vm3, %vm230_vm3  ;;  %s4402_s11 = smov 112   ;;  %s4403_s15 = smov 111   ;;  %vm308_vm3 = vcmask 277504  }
  0x18   : > { %vm4661_vm4 = vmpackc.low %vm231_vm2, %vm231_vm2  ;;  %s4404_s16 = smov 110  }
  0x19   : > { %3663 = vrot.lane.b32.xlu1 %v3662_v8, %s4386_s18  ;;  %3653 = vrot.lane.b32.xlu0 %v4475_v9, %s4386_s18 }
  0x1d   : > { %3673 = vrot.lane.b32.xlu1 %v4489_v13, %s4386_s18  ;;  %3668 = vrot.lane.b32.xlu0 %v4493_v14, %s4386_s18  ;;  %s4405_s18 = smov 98  }
  0x21   : > { %3683 = vrot.lane.b32.xlu1 %v4475_v9, %s4387_s19  ;;  %3678 = vrot.lane.b32.xlu0 %v3647_v5, %s4387_s19 }
  0x25   : > { %3693 = vrot.lane.b32.xlu1 %v3662_v8, %s4387_s19  ;;  %3688 = vrot.lane.b32.xlu0 %v4460_v3, %s4387_s19 }
  0x29   : > { %3703 = vrot.lane.b32.xlu1 %v4489_v13, %s4387_s19  ;;  %3698 = vrot.lane.b32.xlu0 %v4493_v14, %s4387_s19  ;;  %s4406_s19 = smov 97  }
  0x2d   : > { %3713 = vrot.lane.b32.xlu1 %v4475_v9, %s4388_s20  ;;  %3708 = vrot.lane.b32.xlu0 %v3647_v5, %s4388_s20 }
  0x31   : > { %3723 = vrot.lane.b32.xlu1 %v3662_v8, %s4388_s20  ;;  %3718 = vrot.lane.b32.xlu0 %v4460_v3, %s4388_s20 }
  0x35   : > { %3733 = vrot.lane.b32.xlu1 %v4489_v13, %s4388_s20  ;;  %3728 = vrot.lane.b32.xlu0 %v4493_v14, %s4388_s20  ;;  %s4407_s20 = smov 96  }
  0x39   : > { %3743 = vrot.lane.b32.xlu1 %v4475_v9, %s4389_s21  ;;  %3738 = vrot.lane.b32.xlu0 %v3647_v5, %s4389_s21 }
  0x3d   : > { %3753 = vrot.lane.b32.xlu1 %v3662_v8, %s4389_s21  ;;  %3748 = vrot.lane.b32.xlu0 %v4460_v3, %s4389_s21 }
  0x41   : > { %3763 = vrot.lane.b32.xlu1 %v4489_v13, %s4389_s21  ;;  %3758 = vrot.lane.b32.xlu0 %v4493_v14, %s4389_s21  ;;  %s4409_s21 = smov 94  }
  0x45   : > { %3773 = vrot.lane.b32.xlu1 %v4475_v9, %s4390_s22  ;;  %3768 = vrot.lane.b32.xlu0 %v3647_v5, %s4390_s22 }
  0x49   : > { %3783 = vrot.lane.b32.xlu1 %v3662_v8, %s4390_s22  ;;  %3778 = vrot.lane.b32.xlu0 %v4460_v3, %s4390_s22 }
  0x4d   : > { %3793 = vrot.lane.b32.xlu1 %v4489_v13, %s4390_s22  ;;  %3788 = vrot.lane.b32.xlu0 %v4493_v14, %s4390_s22 }
  0x51   : > { %3803 = vrot.lane.b32.xlu1 %v4475_v9, %s4391_s23  ;;  %3798 = vrot.lane.b32.xlu0 %v3647_v5, %s4391_s23 }
  0x55   : > { %3813 = vrot.lane.b32.xlu1 %v3662_v8, %s4391_s23  ;;  %3808 = vrot.lane.b32.xlu0 %v4460_v3, %s4391_s23 }
  0x59   : > { %3823 = vrot.lane.b32.xlu1 %v4489_v13, %s4391_s23  ;;  %3818 = vrot.lane.b32.xlu0 %v4493_v14, %s4391_s23 }
  0x5d   : > { %3833 = vrot.lane.b32.xlu1 %v4475_v9, %s4392_s24  ;;  %3828 = vrot.lane.b32.xlu0 %v3647_v5, %s4392_s24 }
  0x61   : > { %3843 = vrot.lane.b32.xlu1 %v3662_v8, %s4392_s24  ;;  %3838 = vrot.lane.b32.xlu0 %v4460_v3, %s4392_s24 }
  0x65   : > { %3853 = vrot.lane.b32.xlu1 %v4489_v13, %s4392_s24  ;;  %3848 = vrot.lane.b32.xlu0 %v4493_v14, %s4392_s24 }
  0x69   : > { %3863 = vrot.lane.b32.xlu1 %v4475_v9, %s4393_s25  ;;  %3858 = vrot.lane.b32.xlu0 %v3647_v5, %s4393_s25 }
  0x6d   : > { %3873 = vrot.lane.b32.xlu1 %v3662_v8, %s4393_s25  ;;  %3868 = vrot.lane.b32.xlu0 %v4460_v3, %s4393_s25 }
  0x71   : > { %3883 = vrot.lane.b32.xlu1 %v4489_v13, %s4393_s25  ;;  %3878 = vrot.lane.b32.xlu0 %v4493_v14, %s4393_s25 }
  0x75   : > { %3893 = vrot.lane.b32.xlu1 %v4460_v3, %s4394_s26  ;;  %3888 = vrot.lane.b32.xlu0 %v3887_v15, %s4394_s26 }
  0x79   : > { %3903 = vrot.lane.b32.xlu1 %v3902_v16, %s4394_s26  ;;  %3898 = vrot.lane.b32.xlu0 %v5568_v4, %s4394_s26 }
  0x7d   : > { %3913 = vrot.lane.b32.xlu1 %v5568_v4, %s4394_s26  ;;  %3908 = vrot.lane.b32.xlu0 %v4489_v13, %s4394_s26 }
  0x81   : > { %3923 = vrot.lane.b32.xlu1 %v4460_v3, %s4395_s27  ;;  %3918 = vrot.lane.b32.xlu0 %v3887_v15, %s4395_s27 }
  0x85   : > { %3933 = vrot.lane.b32.xlu1 %v3902_v16, %s4395_s27  ;;  %3928 = vrot.lane.b32.xlu0 %v5568_v4, %s4395_s27 }
  0x87   : > { %v4535_v17 = vpop.permute.xlu1 %3658  ;;  %v4537_v18 = vpop.permute.xlu0 %3648 }
  0x89   : > { %3943 = vrot.lane.b32.xlu1 %v5568_v4, %s4395_s27  ;;  %3938 = vrot.lane.b32.xlu0 %v4489_v13, %s4395_s27 }
  0x8b   : > { %v4541_v19 = vpop.permute.xlu1 %3663  ;;  %v4543_v20 = vpop.permute.xlu0 %3653 }
  0x8d   : > { %3953 = vrot.lane.b32.xlu1 %v4460_v3, %s4396_s28  ;;  %3948 = vrot.lane.b32.xlu0 %v3887_v15, %s4396_s28 }
  0x8f   : > { %v4550_v22 = vpop.permute.xlu1 %3673  ;;  %v4552_v23 = vpop.permute.xlu0 %3668 }
  0x91   : > { %3963 = vrot.lane.b32.xlu1 %v4548_v21, %s4397_s29  ;;  %3958 = vrot.lane.b32.xlu0 %v4475_v9, %s4397_s29 }
  0x93   : > { %v4560_v25 = vpop.permute.xlu1 %3683  ;;  %v4562_v26 = vpop.permute.xlu0 %3678 }
  0x95   : > { %3973 = vrot.lane.b32.xlu1 %v4558_v24, %s4397_s29  ;;  %3968 = vrot.lane.b32.xlu0 %v5568_v4, %s4396_s28 }
  0x97   : > { %v4566_v27 = vpop.permute.xlu1 %3693  ;;  %v4568_v28 = vpop.permute.xlu0 %3688 }
  0x99   : > { %3983 = vrot.lane.b32.xlu1 %v4489_v13, %s4396_s28  ;;  %3978 = vrot.lane.b32.xlu0 %v3902_v16, %s4396_s28 }
  0x9b   : > { %v4575_v30 = vpop.permute.xlu1 %3703  ;;  %v4577_v31 = vpop.permute.xlu0 %3698 }
  0x9d   : > { %3993 = vrot.lane.b32.xlu1 %v4573_v29, %s4397_s29  ;;  %3988 = vrot.lane.b32.xlu0 %v4493_v14, %s4397_s29 }
  0x9f   : > { %v4585_v33 = vpop.permute.xlu1 %3713  ;;  %v4587_v34 = vpop.permute.xlu0 %3708 }
  0xa1   : > { %4003 = vrot.lane.b32.xlu1 %v4583_v32, %s4397_s29  ;;  %3998 = vrot.lane.b32.xlu0 %v5568_v4, %s4396_s28 }
  0xa3   : > { %v4591_v35 = vpop.permute.xlu1 %3723  ;;  %v4593_v36 = vpop.permute.xlu0 %3718 }
  0xa5   : > { %4013 = vrot.lane.b32.xlu1 %v4460_v3, %s4398_s30  ;;  %4008 = vrot.lane.b32.xlu0 %v3887_v15, %s4398_s30 }
  0xa7   : > { %v4596_v37 = vpop.permute.xlu1 %3733  ;;  %v4598_v38 = vpop.permute.xlu0 %3728 }
  0xa9   : > { %4023 = vrot.lane.b32.xlu1 %v4548_v21, %s4399_s4  ;;  %4018 = vrot.lane.b32.xlu0 %v4475_v9, %s4399_s4 }
  0xab   : > { %v4602_v39 = vpop.permute.xlu1 %3743  ;;  %v4604_v40 = vpop.permute.xlu0 %3738 }
  0xad   : > { %4033 = vrot.lane.b32.xlu1 %v4558_v24, %s4399_s4  ;;  %4028 = vrot.lane.b32.xlu0 %v5568_v4, %s4398_s30 }
  0xaf   : > { %v4608_v41 = vpop.permute.xlu1 %3753  ;;  %v4610_v42 = vpop.permute.xlu0 %3748 }
  0xb1   : > { %4043 = vrot.lane.b32.xlu1 %v4489_v13, %s4398_s30  ;;  %4038 = vrot.lane.b32.xlu0 %v3902_v16, %s4398_s30 }
  0xb3   : > { %v4613_v43 = vpop.permute.xlu1 %3763  ;;  %v4615_v44 = vpop.permute.xlu0 %3758 }
  0xb5   : > { %4053 = vrot.lane.b32.xlu1 %v4573_v29, %s4399_s4  ;;  %4048 = vrot.lane.b32.xlu0 %v4493_v14, %s4399_s4 }
  0xb7   : > { %v4623_v46 = vpop.permute.xlu1 %3773  ;;  %v4625_v47 = vpop.permute.xlu0 %3768 }
  0xb9   : > { %4063 = vrot.lane.b32.xlu1 %v4583_v32, %s4399_s4  ;;  %4058 = vrot.lane.b32.xlu0 %v5568_v4, %s4398_s30 }
  0xbb   : > { %v4633_v50 = vpop.permute.xlu1 %3783  ;;  %v4635_v51 = vpop.permute.xlu0 %3778 }
  0xbc   : > { %5574 = vst [vmem:[#allocation4_spill] sm:$0xff] %v4633_v50  ;;  %5575 = vst [vmem:[#allocation5_spill] sm:$0xff] %v4635_v51 }
  0xbd   : > { %4073 = vrot.lane.b32.xlu1 %v4548_v21, %s4400_s9  ;;  %4068 = vrot.lane.b32.xlu0 %v4475_v9, %s4400_s9 }
  0xbf   : > { %v4639_v53 = vpop.permute.xlu1 %3793  ;;  %v4641_v54 = vpop.permute.xlu0 %3788 }
  0xc0   : > { %5576 = vst [vmem:[#allocation6_spill] sm:$0xff] %v4639_v53  ;;  %5577 = vst [vmem:[#allocation7_spill] sm:$0xff] %v4641_v54 }
  0xc1   : > { %4083 = vrot.lane.b32.xlu1 %v4493_v14, %s4400_s9  ;;  %4078 = vrot.lane.b32.xlu0 %v4558_v24, %s4400_s9 }
  0xc3   : > { %v3804_v56 = vpop.permute.xlu1 %3803  ;;  %v3799_v57 = vpop.permute.xlu0 %3798 }
  0xc4   : > { %v3805_v59 = vunpack.i.l.bf16 %v3804_v56  ;;  %v3801_v60 = vunpack.i.h.bf16 %v3799_v57  ;;  %v3800_v61 = vunpack.i.l.bf16 %v3799_v57  ;;  %v3806_v3 = vunpack.i.h.bf16 %v3804_v56 }
  0xc5   : > { %4093 = vrot.lane.b32.xlu1 %v4583_v32, %s4400_s9  ;;  %4088 = vrot.lane.b32.xlu0 %v4573_v29, %s4400_s9  ;;  %s170_s9 = scalar_lea.vmem %s5567_s3, %s3119_s14 }
  0xc6   : > { %v755_v8 = vsel %vm753_vm1, %v3801_v60, %v3805_v59  ;;  %v754_v10 = vsel %vm753_vm1, %v3800_v61, %v3801_v60  ;;  %v3106_v60 = vld [vmem:[%s5565_s1 + $0x108] sm:$0xff] }
  0xc7   : > { %v3814_v63 = vpop.permute.xlu1 %3813  ;;  %v3809_v0 = vpop.permute.xlu0 %3808 }
  0xc8   : > { %v3811_v5 = vunpack.i.h.bf16 %v3809_v0  ;;  %v3810_v6 = vunpack.i.l.bf16 %v3809_v0  ;;  %v3816_v13 = vunpack.i.h.bf16 %v3814_v63  ;;  %v3815_v15 = vunpack.i.l.bf16 %v3814_v63 }
  0xc9   : > { %4103 = vrot.lane.b32.xlu1 %v4548_v21, %s4401_s10  ;;  %4098 = vrot.lane.b32.xlu0 %v4475_v9, %s4401_s10 }
  0xca   : > { %v757_v16 = vsel %vm753_vm1, %v3810_v6, %v3811_v5  ;;  %v756_v45 = vsel %vm753_vm1, %v3806_v3, %v3810_v6  ;;  %v758_v61 = vsel %vm753_vm1, %v3815_v15, %v3816_v13 }
  0xcb   : > { %v3824_v48 = vpop.permute.xlu1 %3823  ;;  %v3819_v49 = vpop.permute.xlu0 %3818  ;;  %v3281_v52 = vpack.c.bf16 %v757_v16, %v755_v8  ;;  %v3284_v56 = vpack.c.bf16 %v756_v45, %v754_v10  ;;  %v237_v45 = vadd.s32 1, %v4645_v58 }
  0xcc   : > { %v3826_v57 = vunpack.i.h.bf16 %v3824_v48  ;;  %v3825_v59 = vunpack.i.l.bf16 %v3824_v48  ;;  %v3821_v0 = vunpack.i.h.bf16 %v3819_v49  ;;  %v3820_v4 = vunpack.i.l.bf16 %v3819_v49 }
  0xcd   : > { %4113 = vrot.lane.b32.xlu1 %v4493_v14, %s4401_s10  ;;  %4108 = vrot.lane.b32.xlu0 %v4558_v24, %s4401_s10  ;;  %vm239_vm7 = vcmp.ge.s32.totalorder %v237_v45, 2 }
  0xce   : > { %v761_v63 = vsel %vm753_vm1, %v3825_v59, %v3826_v57  ;;  %v760_v3 = vsel %vm753_vm1, %v3821_v0, %v3825_v59  ;;  %v759_v5 = vsel %vm753_vm1, %v3816_v13, %v3820_v4  ;;  %3283 = vmatprep.subr.msk.bf16.mxu1 %vm4661_vm4, %v3281_v52  ;;  %v236_v4 = vadd.s32 1, %v4649_v62  ;;  %vm4699_vm9 = vmpackc.low %vm239_vm7, %vm239_vm7 }
  0xcf   : > { %3286 = vmatpush1.bf16.msk.msra.mxu1 %vm4665_vm5, %v3284_v56  ;;  %v3834_v6 = vpop.permute.xlu1 %3833  ;;  %v3829_v8 = vpop.permute.xlu0 %3828  ;;  %v3287_v10 = vpack.c.bf16 %v761_v63, %v759_v5  ;;  %v3290_v16 = vpack.c.bf16 %v760_v3, %v758_v61  ;;  %vm1579_vm1 = vcmask 1039360  }
  0xd0   : > { %v3835_v48 = vunpack.i.l.bf16 %v3834_v6  ;;  %v3831_v15 = vunpack.i.h.bf16 %v3829_v8  ;;  %v3830_v49 = vunpack.i.l.bf16 %v3829_v8  ;;  %v3836_v56 = vunpack.i.h.bf16 %v3834_v6 }
  0xd1   : > { %4123 = vrot.lane.b32.xlu1 %v4583_v32, %s4401_s10  ;;  %4118 = vrot.lane.b32.xlu0 %v4573_v29, %s4401_s10  ;;  %vm238_vm8 = vcmp.ge.s32.totalorder %v236_v4, 2 }
  0xd2   : > { %3289 = vmatprep.subr.msk.bf16.mxu1 %vm4661_vm4, %v3287_v10  ;;  %v836_v0 = vsel %vm834_vm6, %v3831_v15, %v3835_v48  ;;  %v835_v61 = vsel %vm834_vm6, %v3830_v49, %v3831_v15  ;;  %vm4703_vm10 = vmpackc.low %vm238_vm8, %vm238_vm8  ;;  %vm1069_vm8 = vcmask 113664  }
  0xd3   : > { %3292 = vmatpush1.bf16.msk.msra.mxu1 %vm4665_vm5, %v3290_v16  ;;  %v3844_v13 = vpop.permute.xlu1 %3843  ;;  %v3839_v52 = vpop.permute.xlu0 %3838 }
  0xd4   : > { %v3841_v57 = vunpack.i.h.bf16 %v3839_v52  ;;  %v3840_v59 = vunpack.i.l.bf16 %v3839_v52  ;;  %v3846_v63 = vunpack.i.h.bf16 %v3844_v13  ;;  %v3845_v3 = vunpack.i.l.bf16 %v3844_v13 }
  0xd5   : > { %4133 = vrot.lane.b32.xlu1 %v4548_v21, %s4402_s11  ;;  %4128 = vrot.lane.b32.xlu0 %v4475_v9, %s4402_s11 }
  0xd6   : > { %v837_v5 = vsel %vm834_vm6, %v3836_v56, %v3840_v59  ;;  %v838_v6 = vsel %vm834_vm6, %v3840_v59, %v3841_v57  ;;  %v839_v13 = vsel %vm834_vm6, %v3845_v3, %v3846_v63 }
  0xd7   : > { %v3854_v8 = vpop.permute.xlu1 %3853  ;;  %v3849_v10 = vpop.permute.xlu0 %3848  ;;  %v3293_v16 = vpack.c.bf16 %v838_v6, %v836_v0  ;;  %v3296_v48 = vpack.c.bf16 %v837_v5, %v835_v61 }
  0xd8   : > { %v3856_v15 = vunpack.i.h.bf16 %v3854_v8  ;;  %v3855_v49 = vunpack.i.l.bf16 %v3854_v8  ;;  %v3851_v52 = vunpack.i.h.bf16 %v3849_v10  ;;  %v3850_v50 = vunpack.i.l.bf16 %v3849_v10 }
  0xd9   : > { %4143 = vrot.lane.b32.xlu1 %v4493_v14, %s4402_s11  ;;  %4138 = vrot.lane.b32.xlu0 %v4558_v24, %s4402_s11 }
  0xda   : > { %v842_v56 = vsel %vm834_vm6, %v3855_v49, %v3856_v15  ;;  %v841_v57 = vsel %vm834_vm6, %v3851_v52, %v3855_v49  ;;  %v840_v59 = vsel %vm834_vm6, %v3846_v63, %v3850_v50  ;;  %3295 = vmatprep.subr.msk.bf16.mxu1 %vm4699_vm9, %v3293_v16 }
  0xdb   : > { %3298 = vmatpush1.bf16.msk.msra.mxu1 %vm4703_vm10, %v3296_v48  ;;  %v3864_v0 = vpop.permute.xlu1 %3863  ;;  %v3859_v61 = vpop.permute.xlu0 %3858  ;;  %v3299_v5 = vpack.c.bf16 %v842_v56, %v840_v59  ;;  %v3302_v6 = vpack.c.bf16 %v841_v57, %v839_v13 }
  0xdc   : > { %v3865_v8 = vunpack.i.l.bf16 %v3864_v0  ;;  %v3861_v10 = vunpack.i.h.bf16 %v3859_v61  ;;  %v3860_v54 = vunpack.i.l.bf16 %v3859_v61  ;;  %v3866_v3 = vunpack.i.h.bf16 %v3864_v0 }
  0xdd   : > { %4153 = vrot.lane.b32.xlu1 %v4583_v32, %s4402_s11  ;;  %4148 = vrot.lane.b32.xlu0 %v4573_v29, %s4402_s11 }
  0xde   : > { %3301 = vmatprep.subr.msk.bf16.mxu1 %vm4699_vm9, %v3299_v5  ;;  %v917_v15 = vsel %vm915_vm11, %v3861_v10, %v3865_v8  ;;  %v916_v49 = vsel %vm915_vm11, %v3860_v54, %v3861_v10 }
  0xdf   : > { %3304 = vmatpush1.bf16.msk.msra.mxu1 %vm4703_vm10, %v3302_v6  ;;  %v3874_v50 = vpop.permute.xlu1 %3873  ;;  %v3869_v63 = vpop.permute.xlu0 %3868 }
  0xe0   : > { %v3871_v16 = vunpack.i.h.bf16 %v3869_v63  ;;  %v3870_v48 = vunpack.i.l.bf16 %v3869_v63  ;;  %v3876_v52 = vunpack.i.h.bf16 %v3874_v50  ;;  %v3875_v13 = vunpack.i.l.bf16 %v3874_v50 }
  0xe1   : > { %4163 = vrot.lane.b32.xlu1 %v4548_v21, %s4403_s15  ;;  %4158 = vrot.lane.b32.xlu0 %v4475_v9, %s4403_s15 }
  0xe2   : > { %v919_v56 = vsel %vm915_vm11, %v3870_v48, %v3871_v16  ;;  %v918_v57 = vsel %vm915_vm11, %v3866_v3, %v3870_v48  ;;  %v920_v10 = vsel %vm915_vm11, %v3875_v13, %v3876_v52 }
  0xe3   : > { %v3884_v59 = vpop.permute.xlu1 %3883  ;;  %v3879_v0 = vpop.permute.xlu0 %3878  ;;  %v3305_v61 = vpack.c.bf16 %v919_v56, %v917_v15  ;;  %v3307_v5 = vpack.c.bf16 %v918_v57, %v916_v49 }
  0xe4   : > { %v3886_v6 = vunpack.i.h.bf16 %v3884_v59  ;;  %v3885_v63 = vunpack.i.l.bf16 %v3884_v59  ;;  %v3881_v53 = vunpack.i.h.bf16 %v3879_v0  ;;  %v3880_v51 = vunpack.i.l.bf16 %v3879_v0 }
  0xe5   : > { %4173 = vrot.lane.b32.xlu1 %v4493_v14, %s4403_s15  ;;  %4168 = vrot.lane.b32.xlu0 %v4558_v24, %s4403_s15 }
  0xe6   : > { %3306 = vmatprep.subr.bf16.mxu1 %v3305_v61  ;;  %v921_v54 = vsel %vm915_vm11, %v3876_v52, %v3880_v51  ;;  %v923_v8 = vsel %vm915_vm11, %v3885_v63, %v3886_v6  ;;  %v922_v50 = vsel %vm915_vm11, %v3881_v53, %v3885_v63 }
  0xe7   : > { %3308 = vmatpush1.bf16.msra.mxu1 %v3307_v5  ;;  %v3894_v3 = vpop.permute.xlu1 %3893  ;;  %v3889_v16 = vpop.permute.xlu0 %3888  ;;  %v3309_v48 = vpack.c.bf16 %v923_v8, %v921_v54  ;;  %v3311_v15 = vpack.c.bf16 %v922_v50, %v920_v10 }
  0xe8   : > { %v3896_v49 = vunpack.i.h.bf16 %v3894_v3  ;;  %v3895_v56 = vunpack.i.l.bf16 %v3894_v3  ;;  %v3891_v57 = vunpack.i.h.bf16 %v3889_v16  ;;  %v3890_v59 = vunpack.i.l.bf16 %v3889_v16 }
  0xe9   : > { %4183 = vrot.lane.b32.xlu1 %v4583_v32, %s4403_s15  ;;  %4178 = vrot.lane.b32.xlu0 %v4573_v29, %s4403_s15 }
  0xea   : > { %3310 = vmatprep.subr.bf16.mxu1 %v3309_v48  ;;  %v1403_v51 = vsel %vm1401_vm12, %v3890_v59, %v3891_v57  ;;  %v1405_v53 = vsel %vm1401_vm12, %v3895_v56, %v3896_v49 }
  0xeb   : > { %3312 = vmatpush1.bf16.msra.mxu1 %v3311_v15  ;;  %v3904_v52 = vpop.permute.xlu1 %3903  ;;  %v3899_v13 = vpop.permute.xlu0 %3898  ;;  %v3393_v0 = vpack.c.bf16 %v1405_v53, %v1403_v51 }
  0xec   : > { %v3901_v61 = vunpack.i.h.bf16 %v3899_v13  ;;  %v3900_v5 = vunpack.i.l.bf16 %v3899_v13  ;;  %v3906_v6 = vunpack.i.h.bf16 %v3904_v52  ;;  %v3905_v63 = vunpack.i.l.bf16 %v3904_v52 }
  0xed   : > { %4193 = vrot.lane.b32.xlu1 %v4548_v21, %s4404_s16  ;;  %4188 = vrot.lane.b32.xlu0 %v4475_v9, %s4404_s16 }
  0xee   : > { %3395 = vmatprep.subr.msk.bf16.mxu0 %vm4661_vm4, %v3393_v0  ;;  %v1402_v54 = vsel %vm1401_vm12, %v3900_v5, %v3890_v59  ;;  %v1404_v8 = vsel %vm1401_vm12, %v3901_v61, %v3895_v56  ;;  %v1407_v57 = vsel %vm1401_vm12, %v3905_v63, %v3906_v6 }
  0xef   : > { %v3914_v10 = vpop.permute.xlu1 %3913  ;;  %v3909_v50 = vpop.permute.xlu0 %3908  ;;  %v3396_v3 = vpack.c.bf16 %v1404_v8, %v1402_v54 }
  0xf0   : > { %v3916_v16 = vunpack.i.h.bf16 %v3914_v10  ;;  %v3915_v48 = vunpack.i.l.bf16 %v3914_v10  ;;  %v3911_v15 = vunpack.i.h.bf16 %v3909_v50  ;;  %v3910_v49 = vunpack.i.l.bf16 %v3909_v50 }
  0xf1   : > { %4203 = vrot.lane.b32.xlu1 %v4493_v14, %s4404_s16  ;;  %4198 = vrot.lane.b32.xlu0 %v4558_v24, %s4404_s16 }
  0xf2   : > { %v1406_v51 = vsel %vm1401_vm12, %v3915_v48, %v3905_v63  ;;  %v1408_v59 = vsel %vm1401_vm12, %v3916_v16, %v3910_v49  ;;  %v1409_v56 = vsel %vm1401_vm12, %v3910_v49, %v3911_v15  ;;  %3398 = vmatpush1.bf16.msk.msra.mxu0 %vm4665_vm5, %v3396_v3  ;;  %vm389_vm12 = vcmask 269312  }
  0xf3   : > { %v3399_v53 = vpack.c.bf16 %v1409_v56, %v1407_v57  ;;  %v3402_v52 = vpack.c.bf16 %v1408_v59, %v1406_v51  ;;  %v3924_v13 = vpop.permute.xlu1 %3923  ;;  %v3919_v0 = vpop.permute.xlu0 %3918 }
  0xf4   : > { %v3926_v61 = vunpack.i.h.bf16 %v3924_v13  ;;  %v3925_v5 = vunpack.i.l.bf16 %v3924_v13  ;;  %v3921_v54 = vunpack.i.h.bf16 %v3919_v0  ;;  %v3920_v8 = vunpack.i.l.bf16 %v3919_v0 }
  0xf5   : > { %4213 = vrot.lane.b32.xlu1 %v4583_v32, %s4404_s16  ;;  %4208 = vrot.lane.b32.xlu0 %v4573_v29, %s4404_s16 }
  0xf6   : > { %v1486_v6 = vsel %vm1482_vm13, %v3925_v5, %v3926_v61  ;;  %v1484_v63 = vsel %vm1482_vm13, %v3920_v8, %v3921_v54  ;;  %3401 = vmatprep.subr.msk.bf16.mxu0 %vm4661_vm4, %v3399_v53 }
  0xf7   : > { %v3405_v10 = vpack.c.bf16 %v1486_v6, %v1484_v63  ;;  %3404 = vmatpush1.bf16.msk.msra.mxu0 %vm4665_vm5, %v3402_v52  ;;  %v3934_v50 = vpop.permute.xlu1 %3933  ;;  %v3929_v3 = vpop.permute.xlu0 %3928  ;;  %v245_v52 = vadd.s32 3, %v4645_v58 }
  0xf8   : > { %v3931_v16 = vunpack.i.h.bf16 %v3929_v3  ;;  %v3930_v48 = vunpack.i.l.bf16 %v3929_v3  ;;  %v3936_v15 = vunpack.i.h.bf16 %v3934_v50  ;;  %v3935_v49 = vunpack.i.l.bf16 %v3934_v50 }
  0xf9   : > { %4223 = vrot.lane.b32.xlu1 %v4548_v21, %s4405_s18  ;;  %4218 = vrot.lane.b32.xlu0 %v4475_v9, %s4405_s18  ;;  %vm249_vm15 = vcmp.lt.s32.totalorder %v245_v52, 18  ;;  %v3661_v52 = vunpack.i.h.bf16 %v4535_v17 }
  0xfa   : > { %v1485_v57 = vsel %vm1482_vm13, %v3931_v16, %v3925_v5  ;;  %v1483_v51 = vsel %vm1482_vm13, %v3930_v48, %v3920_v8  ;;  %3407 = vmatprep.subr.msk.bf16.mxu0 %vm4699_vm9, %v3405_v10  ;;  %v1488_v5 = vsel %vm1482_vm13, %v3935_v49, %v3936_v15  ;;  %vm4818_vm2 = vmpackc.low %vm249_vm15, %vm249_vm15 }
  0xfb   : > { %v3408_v59 = vpack.c.bf16 %v1485_v57, %v1483_v51  ;;  %v3944_v56 = vpop.permute.xlu1 %3943  ;;  %v3939_v53 = vpop.permute.xlu0 %3938 }
  0xfc   : > { %v3946_v13 = vunpack.i.h.bf16 %v3944_v56  ;;  %v3945_v0 = vunpack.i.l.bf16 %v3944_v56  ;;  %v3941_v61 = vunpack.i.h.bf16 %v3939_v53  ;;  %v3940_v54 = vunpack.i.l.bf16 %v3939_v53 }
  0xfd   : > { %4233 = vrot.lane.b32.xlu1 %v4493_v14, %s4405_s18  ;;  %4228 = vrot.lane.b32.xlu0 %v4558_v24, %s4405_s18  ;;  %v3417_v24 = vpack.c.bf16 %v4453_v1, %v4468_v7 }
  0xfe   : > { %v1487_v8 = vsel %vm1482_vm13, %v3945_v0, %v3935_v49  ;;  %v1489_v6 = vsel %vm1482_vm13, %v3946_v13, %v3940_v54  ;;  %v1490_v63 = vsel %vm1482_vm13, %v3940_v54, %v3941_v61  ;;  %3410 = vmatpush1.bf16.msk.msra.mxu0 %vm4703_vm10, %v3408_v59  ;;  %v3421_v13 = vpack.c.bf16 %v4481_v11, %v4484_v12 }
  0xff   : > { %v3411_v10 = vpack.c.bf16 %v1490_v63, %v1488_v5  ;;  %v3414_v50 = vpack.c.bf16 %v1489_v6, %v1487_v8  ;;  %v4796_v3 = vpop.permute.xlu1 %3953  ;;  %v4798_v16 = vpop.permute.xlu0 %3948  ;;  %v244_v0 = vadd.s32 3, %v4649_v62  ;;  %v3660_v12 = vunpack.i.l.bf16 %v4535_v17 }
 0x100   : > { %v3956_v48 = vunpack.i.h.bf16 %v4796_v3  ;;  %v3955_v15 = vunpack.i.l.bf16 %v4796_v3  ;;  %v3951_v49 = vunpack.i.h.bf16 %v4798_v16  ;;  %v3950_v57 = vunpack.i.l.bf16 %v4798_v16  ;;  %v4371_v16 = vld [vmem:[%s4447_s17 + $0x20] sm:$0xff] }
 0x101   : > { %4243 = vrot.lane.b32.xlu1 %v4583_v32, %s4405_s18  ;;  %4238 = vrot.lane.b32.xlu0 %v4573_v29, %s4405_s18  ;;  %v4369_v29 = vld [vmem:[%s4447_s17 + $0x10] sm:$0xff]  ;;  %v3651_v6 = vunpack.i.h.bf16 %v4537_v18  ;;  %vm248_vm6 = vcmp.lt.s32.totalorder %v244_v0, 18  ;;  %v4374_v0 = vld [vmem:[%s4447_s17 + $0x18] sm:$0xff]  ;;  %vm1660_vm13 = vcmask 1031168  }
 0x102   : > { %v992_v51 = vsel %vm988_vm14, %v3955_v15, %v3956_v48  ;;  %v990_v59 = vsel %vm988_vm14, %v3950_v57, %v3951_v49  ;;  %3413 = vmatprep.subr.msk.bf16.mxu0 %vm4699_vm9, %v3411_v10  ;;  %v3419_v53 = vpack.c.bf16 %v4369_v29, %v4456_v2  ;;  %v4370_v2 = vld [vmem:[%s4447_s17] sm:$0xff]  ;;  %vm4868_vm7 = vmpackc.low %vm248_vm6, %vm248_vm6  ;;  %vm543_vm6 = vcmask 252928  }
 0x103   : > { %v3313_v1 = vpack.c.bf16 %v992_v51, %v990_v59  ;;  %3416 = vmatpush1.bf16.msk.msra.mxu0 %vm4703_vm10, %v3414_v50  ;;  %v3964_v7 = vpop.permute.xlu1 %3963  ;;  %v3959_v56 = vpop.permute.xlu0 %3958  ;;  %v4833_v11 = vpack.i.bf16 %v4369_v29, %v4370_v2  ;;  %v3650_v50 = vunpack.i.l.bf16 %v4537_v18  ;;  %v5588_v29 = vmov 0.0  }
 0x104   : > { %v3966_v61 = vunpack.i.h.bf16 %v3964_v7  ;;  %v3965_v54 = vunpack.i.l.bf16 %v3964_v7  ;;  %v3961_v5 = vunpack.i.h.bf16 %v3959_v56  ;;  %v3960_v8 = vunpack.i.l.bf16 %v3959_v56  ;;  %3418 = vmatprep.subr.bf16.mxu0 %v3417_v24  ;;  %v4372_v24 = vld [vmem:[%s4447_s17 + $0x30] sm:$0xff]  ;;  %v4373_v56 = vld [vmem:[%s4447_s17 + $0x38] sm:$0xff] }
 0x105   : > { %4253 = vrot.lane.b32.xlu1 %v4548_v21, %s4406_s19  ;;  %4248 = vrot.lane.b32.xlu0 %v4475_v9, %s4406_s19  ;;  %v3656_v21 = vunpack.i.h.bf16 %v4543_v20  ;;  %v3423_v17 = vpack.c.bf16 %v4372_v24, %v4371_v16  ;;  %v3655_v7 = vunpack.i.l.bf16 %v4543_v20  ;;  %v4850_v18 = vpack.i.bf16 %v4372_v24, %v4371_v16 }
 0x106   : > { %v1583_v63 = vsel %vm1579_vm1, %v3965_v54, %v3966_v61  ;;  %v1581_v10 = vsel %vm1579_vm1, %v3960_v8, %v3961_v5  ;;  %3315 = vmatprep.subr.msk.bf16.mxu1 %vm4818_vm2, %v3313_v1  ;;  %v4861_v2 = vsel %vm308_vm3, %v3660_v12, %v3661_v52  ;;  %v3665_v16 = vunpack.i.l.bf16 %v4541_v19 }
 0x107   : > { %3420 = vmatpush1.bf16.msra.mxu0 %v3419_v53  ;;  %v3974_v9 = vpop.permute.xlu1 %3973  ;;  %v3969_v3 = vpop.permute.xlu0 %3968  ;;  %v3425_v1 = vpack.c.bf16 %v1583_v63, %v1581_v10  ;;  %v4854_v53 = vpack.i.bf16 %v5588_v29, %v4373_v56  ;;  %v4882_v24 = vpack.i.bf16 %v5588_v29, %v4374_v0  ;;  %v3675_v56 = vunpack.i.l.bf16 %v4550_v22 }
 0x108   : > { %v3976_v48 = vunpack.i.h.bf16 %v3974_v9  ;;  %v3975_v49 = vunpack.i.l.bf16 %v3974_v9  ;;  %v3971_v51 = vunpack.i.h.bf16 %v3969_v3  ;;  %v3970_v59 = vunpack.i.l.bf16 %v3969_v3  ;;  %3422 = vmatprep.subr.bf16.mxu0 %v3421_v13 }
 0x109   : > { %4263 = vrot.lane.b32.xlu1 %v4493_v14, %s4406_s19  ;;  %4258 = vrot.lane.b32.xlu0 %v4833_v11, %s4406_s19  ;;  %v4864_v14 = vsel %vm308_vm3, %v3650_v50, %v3651_v6  ;;  %v3666_v50 = vunpack.i.h.bf16 %v4541_v19 }
 0x10a   : > { %v1582_v61 = vsel %vm1579_vm1, %v3976_v48, %v3965_v54  ;;  %v1580_v5 = vsel %vm1579_vm1, %v3975_v49, %v3960_v8  ;;  %v991_v13 = vsel %vm988_vm14, %v3971_v51, %v3955_v15  ;;  %v989_v20 = vsel %vm988_vm14, %v3970_v59, %v3950_v57 }
 0x10b   : > { %v3428_v63 = vpack.c.bf16 %v1582_v61, %v1580_v5  ;;  %v3316_v10 = vpack.c.bf16 %v991_v13, %v989_v20  ;;  %3424 = vmatpush1.bf16.msra.mxu0 %v3423_v17  ;;  %v3984_v9 = vpop.permute.xlu1 %3983  ;;  %v3979_v3 = vpop.permute.xlu0 %3978  ;;  %v4375_v17 = vld [vmem:[%s4447_s17 + $0x8] sm:$0xff]  ;;  %v4889_v49 = vsel %vm308_vm3, %v3656_v21, %v3660_v12  ;;  %v4892_v51 = vsel %vm308_vm3, %v3651_v6, %v3655_v7 }
 0x10c   : > { %v3986_v15 = vunpack.i.h.bf16 %v3984_v9  ;;  %v3985_v57 = vunpack.i.l.bf16 %v3984_v9  ;;  %v3981_v8 = vunpack.i.h.bf16 %v3979_v3  ;;  %v3980_v52 = vunpack.i.l.bf16 %v3979_v3  ;;  %3427 = vmatprep.subr.msk.bf16.mxu0 %vm4818_vm2, %v3425_v1 }
 0x10d   : > { %4273 = vrot.lane.b32.xlu1 %v4850_v18, %s4406_s19  ;;  %4268 = vrot.lane.b32.xlu0 %v4854_v53, %s4406_s19  ;;  %v4886_v48 = vpack.i.bf16 %v5588_v29, %v4375_v17  ;;  %v3676_v1 = vunpack.i.h.bf16 %v4550_v22  ;;  %v3671_v61 = vunpack.i.h.bf16 %v4552_v23  ;;  %v4904_v9 = vsel %vm308_vm3, %v3665_v16, %v3666_v50  ;;  %v4376_v22 = vld [vmem:[%s4447_s17 + $0x28] sm:$0xff]  ;;  %s4408_s17 = smov 95  }
 0x10e   : > { %v996_v19 = vsel %vm988_vm14, %v3985_v57, %v3986_v15  ;;  %v994_v59 = vsel %vm988_vm14, %v3980_v52, %v3981_v8  ;;  %3318 = vmatpush1.bf16.msk.msra.mxu1 %vm4868_vm7, %v3316_v10  ;;  %v3670_v10 = vunpack.i.l.bf16 %v4552_v23 }
 0x10f   : > { %v3319_v5 = vpack.c.bf16 %v996_v19, %v994_v59  ;;  %3430 = vmatpush1.bf16.msk.msra.mxu0 %vm4868_vm7, %v3428_v63  ;;  %v3994_v12 = vpop.permute.xlu1 %3993  ;;  %v3989_v6 = vpop.permute.xlu0 %3988  ;;  %v4913_v63 = vpack.i.bf16 %v5588_v29, %v4376_v22  ;;  %v4924_v16 = vsel %vm308_vm3, %v3675_v56, %v3676_v1  ;;  %v4927_v0 = vsel %vm308_vm3, %v3671_v61, %v3675_v56 }
 0x110   : > { %v3996_v21 = vunpack.i.h.bf16 %v3994_v12  ;;  %v3995_v7 = vunpack.i.l.bf16 %v3994_v12  ;;  %v3991_v13 = vunpack.i.h.bf16 %v3989_v6  ;;  %v3990_v20 = vunpack.i.l.bf16 %v3989_v6 }
 0x111   : > { %4283 = vrot.lane.b32.xlu1 %v4882_v24, %s4407_s20  ;;  %4278 = vrot.lane.b32.xlu0 %v4886_v48, %s4407_s20  ;;  %v253_v59 = vadd.s32 4, %v4645_v58 }
 0x112   : > { %v1587_v15 = vsel %vm1579_vm1, %v3995_v7, %v3996_v21  ;;  %v1585_v8 = vsel %vm1579_vm1, %v3990_v20, %v3991_v13  ;;  %3321 = vmatprep.subr.msk.bf16.mxu1 %vm4818_vm2, %v3319_v5  ;;  %v4931_v5 = vsel %vm308_vm3, %v3666_v50, %v3670_v10  ;;  %vm1899_vm3 = vcmask 932864  }
 0x113   : > { %v3431_v29 = vpack.c.bf16 %v1587_v15, %v1585_v8  ;;  %v4004_v17 = vpop.permute.xlu1 %4003  ;;  %v3999_v19 = vpop.permute.xlu0 %3998  ;;  %vm257_vm11 = vcmp.lt.s32.totalorder %v253_v59, 18  ;;  %v3686_v59 = vunpack.i.h.bf16 %v4560_v25 }
 0x114   : > { %v4006_v12 = vunpack.i.h.bf16 %v4004_v17  ;;  %v4005_v6 = vunpack.i.l.bf16 %v4004_v17  ;;  %v4001_v21 = vunpack.i.h.bf16 %v3999_v19  ;;  %v4000_v13 = vunpack.i.l.bf16 %v3999_v19 }
 0x115   : > { %4293 = vrot.lane.b32.xlu1 %v4913_v63, %s4407_s20  ;;  %4288 = vrot.lane.b32.xlu0 %v4833_v11, %s4407_s20 }
 0x116   : > { %v1584_v1 = vsel %vm1579_vm1, %v4005_v6, %v3990_v20  ;;  %v1586_v56 = vsel %vm1579_vm1, %v4006_v12, %v3995_v7  ;;  %v995_v61 = vsel %vm988_vm14, %v4001_v21, %v3985_v57  ;;  %v993_v58 = vsel %vm988_vm14, %v4000_v13, %v3980_v52  ;;  %3433 = vmatprep.subr.msk.bf16.mxu0 %vm4818_vm2, %v3431_v29  ;;  %vm4960_vm14 = vmpackc.low %vm257_vm11, %vm257_vm11 }
 0x117   : > { %v3434_v22 = vpack.c.bf16 %v1586_v56, %v1584_v1  ;;  %v3322_v50 = vpack.c.bf16 %v995_v61, %v993_v58  ;;  %v4014_v10 = vpop.permute.xlu1 %4013  ;;  %v4009_v15 = vpop.permute.xlu0 %4008  ;;  %v3685_v57 = vunpack.i.l.bf16 %v4560_v25  ;;  %v3681_v52 = vunpack.i.h.bf16 %v4562_v26  ;;  %v3112_v1 = vld [vmem:[%s5565_s1 + $0x138] sm:$0xff] }
 0x118   : > { %v4016_v8 = vunpack.i.h.bf16 %v4014_v10  ;;  %v4015_v17 = vunpack.i.l.bf16 %v4014_v10  ;;  %v4011_v19 = vunpack.i.h.bf16 %v4009_v15  ;;  %v4010_v3 = vunpack.i.l.bf16 %v4009_v15 }
 0x119   : > { %4303 = vrot.lane.b32.xlu1 %v4850_v18, %s4407_s20  ;;  %4298 = vrot.lane.b32.xlu0 %v4854_v53, %s4407_s20  ;;  %v3680_v12 = vunpack.i.l.bf16 %v4562_v26  ;;  %v252_v56 = vadd.s32 4, %v4649_v62  ;;  %vm624_vm11 = vcmask 244736  }
 0x11a   : > { %v1073_v20 = vsel %vm1069_vm8, %v4015_v17, %v4016_v8  ;;  %v1071_v29 = vsel %vm1069_vm8, %v4010_v3, %v4011_v19  ;;  %3324 = vmatpush1.bf16.msk.msra.mxu1 %vm4868_vm7, %v3322_v50  ;;  %3436 = vmatpush1.bf16.msk.msra.mxu0 %vm4868_vm7, %v3434_v22  ;;  %v4973_v22 = vsel %vm389_vm12, %v3681_v52, %v3685_v57  ;;  %v3690_v19 = vunpack.i.l.bf16 %v4568_v28 }
 0x11b   : > { %v3325_v6 = vpack.c.bf16 %v1073_v20, %v1071_v29  ;;  %v4024_v21 = vpop.permute.xlu1 %4023  ;;  %v4019_v13 = vpop.permute.xlu0 %4018  ;;  %v4980_v8 = vsel %vm389_vm12, %v3680_v12, %v3681_v52  ;;  %vm256_vm15 = vcmp.lt.s32.totalorder %v252_v56, 18  ;;  %v3705_v56 = vunpack.i.l.bf16 %v4575_v30 }
 0x11c   : > { %v4026_v61 = vunpack.i.h.bf16 %v4024_v21  ;;  %v4025_v58 = vunpack.i.l.bf16 %v4024_v21  ;;  %v4021_v50 = vunpack.i.h.bf16 %v4019_v13  ;;  %v4020_v10 = vunpack.i.l.bf16 %v4019_v13  ;;  %vm5001_vm1 = vmpackc.low %vm256_vm15, %vm256_vm15 }
 0x11d   : > { %4313 = vrot.lane.b32.xlu1 %v4882_v24, %s4408_s17  ;;  %4308 = vrot.lane.b32.xlu0 %v4886_v48, %s4408_s17  ;;  %vm2215_vm15 = vcmask 900096  }
 0x11e   : > { %v1664_v62 = vsel %vm1660_vm13, %v4025_v58, %v4026_v61  ;;  %v1662_v15 = vsel %vm1660_vm13, %v4020_v10, %v4021_v50  ;;  %3327 = vmatprep.subr.msk.bf16.mxu1 %vm4960_vm14, %v3325_v6  ;;  %v3696_v61 = vunpack.i.h.bf16 %v4566_v27  ;;  %v3691_v50 = vunpack.i.h.bf16 %v4568_v28 }
 0x11f   : > { %v3437_v20 = vpack.c.bf16 %v1664_v62, %v1662_v15  ;;  %v4034_v29 = vpop.permute.xlu1 %4033  ;;  %v4029_v21 = vpop.permute.xlu0 %4028  ;;  %v3695_v15 = vunpack.i.l.bf16 %v4566_v27  ;;  %v4997_v28 = vsel %vm389_vm12, %v3686_v59, %v3690_v19  ;;  %v3706_v27 = vunpack.i.h.bf16 %v4575_v30 }
 0x120   : > { %v4036_v25 = vunpack.i.h.bf16 %v4034_v29  ;;  %v4035_v13 = vunpack.i.l.bf16 %v4034_v29  ;;  %v4031_v57 = vunpack.i.h.bf16 %v4029_v21  ;;  %v4030_v7 = vunpack.i.l.bf16 %v4029_v21 }
 0x121   : > { %4323 = vrot.lane.b32.xlu1 %v4913_v63, %s4408_s17  ;;  %4318 = vrot.lane.b32.xlu0 %v4833_v11, %s4408_s17  ;;  %v3701_v59 = vunpack.i.h.bf16 %v4577_v31  ;;  %v3700_v30 = vunpack.i.l.bf16 %v4577_v31 }
 0x122   : > { %v1661_v52 = vsel %vm1660_vm13, %v4035_v13, %v4020_v10  ;;  %v1663_v12 = vsel %vm1660_vm13, %v4036_v25, %v4025_v58  ;;  %v1072_v6 = vsel %vm1069_vm8, %v4031_v57, %v4015_v17  ;;  %v1070_v62 = vsel %vm1069_vm8, %v4030_v7, %v4010_v3  ;;  %3439 = vmatprep.subr.msk.bf16.mxu0 %vm4960_vm14, %v3437_v20  ;;  %v3107_v58 = vld [vmem:[%s5565_s1 + $0x110] sm:$0xff] }
 0x123   : > { %v3440_v29 = vpack.c.bf16 %v1663_v12, %v1661_v52  ;;  %v3328_v21 = vpack.c.bf16 %v1072_v6, %v1070_v62  ;;  %v4044_v26 = vpop.permute.xlu1 %4043  ;;  %v4039_v23 = vpop.permute.xlu0 %4038  ;;  %v5006_v20 = vsel %vm389_vm12, %v3690_v19, %v3691_v50  ;;  %v5037_v31 = vsel %vm389_vm12, %v3701_v59, %v3705_v56 }
 0x124   : > { %v4046_v17 = vunpack.i.h.bf16 %v4044_v26  ;;  %v4045_v3 = vunpack.i.l.bf16 %v4044_v26  ;;  %v4041_v7 = vunpack.i.h.bf16 %v4039_v23  ;;  %v4040_v10 = vunpack.i.l.bf16 %v4039_v23 }
 0x125   : > { %4333 = vrot.lane.b32.xlu1 %v4850_v18, %s4408_s17  ;;  %4328 = vrot.lane.b32.xlu0 %v4854_v53, %s4408_s17  ;;  %v5022_v23 = vsel %vm389_vm12, %v3695_v15, %v3696_v61 }
 0x126   : > { %v1077_v25 = vsel %vm1069_vm8, %v4045_v3, %v4046_v17  ;;  %v1075_v26 = vsel %vm1069_vm8, %v4040_v10, %v4041_v7  ;;  %3330 = vmatpush1.bf16.msk.msra.mxu1 %vm5001_vm1, %v3328_v21  ;;  %3442 = vmatpush1.bf16.msk.msra.mxu0 %vm5001_vm1, %v3440_v29  ;;  %v5034_v29 = vsel %vm389_vm12, %v3705_v56, %v3706_v27  ;;  %v3711_v7 = vunpack.i.h.bf16 %v4587_v34 }
 0x127   : > { %v3331_v13 = vpack.c.bf16 %v1077_v25, %v1075_v26  ;;  %v4054_v57 = vpop.permute.xlu1 %4053  ;;  %v4049_v50 = vpop.permute.xlu0 %4048 }
 0x128   : > { %v4056_v52 = vunpack.i.h.bf16 %v4054_v57  ;;  %v4055_v12 = vunpack.i.l.bf16 %v4054_v57  ;;  %v4051_v6 = vunpack.i.h.bf16 %v4049_v50  ;;  %v4050_v62 = vunpack.i.l.bf16 %v4049_v50 }
 0x129   : > { %4343 = vrot.lane.b32.xlu1 %v4882_v24, %s4409_s21  ;;  %4338 = vrot.lane.b32.xlu0 %v4886_v48, %s4409_s21  ;;  %v5044_v24 = vsel %vm389_vm12, %v3696_v61, %v3700_v30  ;;  %v3715_v48 = vunpack.i.l.bf16 %v4585_v33  ;;  %vm2061_vm12 = vcmask 916480  }
 0x12a   : > { %v1668_v21 = vsel %vm1660_vm13, %v4055_v12, %v4056_v52  ;;  %v1666_v17 = vsel %vm1660_vm13, %v4050_v62, %v4051_v6  ;;  %3333 = vmatprep.subr.msk.bf16.mxu1 %vm4960_vm14, %v3331_v13  ;;  %v3710_v52 = vunpack.i.l.bf16 %v4587_v34  ;;  %v3726_v6 = vunpack.i.h.bf16 %v4591_v35 }
 0x12b   : > { %v3443_v25 = vpack.c.bf16 %v1668_v21, %v1666_v17  ;;  %v4064_v27 = vpop.permute.xlu1 %4063  ;;  %v4059_v26 = vpop.permute.xlu0 %4058  ;;  %v3725_v34 = vunpack.i.l.bf16 %v4591_v35 }
 0x12c   : > { %v4066_v57 = vunpack.i.h.bf16 %v4064_v27  ;;  %v4065_v56 = vunpack.i.l.bf16 %v4064_v27  ;;  %v4061_v59 = vunpack.i.h.bf16 %v4059_v26  ;;  %v4060_v50 = vunpack.i.l.bf16 %v4059_v26 }
 0x12d   : > { %4353 = vrot.lane.b32.xlu1 %v4913_v63, %s4409_s21  ;;  %4348 = vrot.lane.b32.xlu0 %v4833_v11, %s4409_s21 }
 0x12e   : > { %v1665_v61 = vsel %vm1660_vm13, %v4065_v56, %v4050_v62  ;;  %v1667_v30 = vsel %vm1660_vm13, %v4066_v57, %v4055_v12  ;;  %v1076_v13 = vsel %vm1069_vm8, %v4061_v59, %v4045_v3  ;;  %v1074_v21 = vsel %vm1069_vm8, %v4060_v50, %v4040_v10  ;;  %3445 = vmatprep.subr.msk.bf16.mxu0 %vm4960_vm14, %v3443_v25 }
 0x12f   : > { %v3446_v17 = vpack.c.bf16 %v1667_v30, %v1665_v61  ;;  %v3334_v27 = vpack.c.bf16 %v1076_v13, %v1074_v21  ;;  %v4074_v63 = vpop.permute.xlu1 %4073  ;;  %v4069_v26 = vpop.permute.xlu0 %4068  ;;  %v3358_v12 = vpack.c.bf16 %v5037_v31, %v5022_v23  ;;  %v3716_v3 = vunpack.i.h.bf16 %v4585_v33  ;;  %v3065_v33 = vld [vmem:[%s5565_s1 + $0x40] sm:$0xff] }
 0x130   : > { %v4076_v19 = vunpack.i.h.bf16 %v4074_v63  ;;  %v4075_v11 = vunpack.i.l.bf16 %v4074_v63  ;;  %v4071_v15 = vunpack.i.h.bf16 %v4069_v26  ;;  %v4070_v62 = vunpack.i.l.bf16 %v4069_v26  ;;  %v3081_v30 = vld [vmem:[%s5565_s1 + $0x80] sm:$0xff] }
 0x131   : > { %4363 = vrot.lane.b32.xlu1 %v4850_v18, %s4409_s21  ;;  %4358 = vrot.lane.b32.xlu0 %v4854_v53, %s4409_s21  ;;  %v3355_v10 = vpack.c.bf16 %v5034_v29, %v5044_v24  ;;  %v5071_v25 = vsel %vm470_vm0, %v3710_v52, %v3711_v7  ;;  %v3720_v57 = vunpack.i.l.bf16 %v4593_v36  ;;  %v3721_v18 = vunpack.i.h.bf16 %v4593_v36  ;;  %v3088_v29 = vld [vmem:[%s5565_s1 + $0xb8] sm:$0xff] }
 0x132   : > { %v1903_v56 = vsel %vm1899_vm3, %v4075_v11, %v4076_v19  ;;  %v1901_v59 = vsel %vm1899_vm3, %v4070_v62, %v4071_v15  ;;  %3336 = vmatpush1.bf16.msk.msra.mxu1 %vm5001_vm1, %v3334_v27  ;;  %3448 = vmatpush1.bf16.msk.msra.mxu0 %vm5001_vm1, %v3446_v17  ;;  %v3735_v53 = vunpack.i.l.bf16 %v4596_v37  ;;  %v3731_v50 = vunpack.i.h.bf16 %v4598_v38 }
 0x133   : > { %v3449_v52 = vpack.c.bf16 %v1903_v56, %v1901_v59  ;;  %v5595_v19 = vpack.c.bf16 %v4861_v2, %v4892_v51  ;;  %v4084_v15 = vpop.permute.xlu1 %4083  ;;  %v4079_v61 = vpop.permute.xlu0 %4078  ;;  %v4410_v13 = vmov 0   ;;  %v5097_v36 = vsel %vm470_vm0, %v3725_v34, %v3726_v6  ;;  %v3068_v51 = vld [vmem:[%s5565_s1 + $0x58] sm:$0xff] }
 0x134   : > { %4368 = vset.pattern.permute.xlu1 %v4410_v13  ;;  %v4081_v21 = vunpack.i.h.bf16 %v4079_v61  ;;  %v4080_v17 = vunpack.i.l.bf16 %v4079_v61  ;;  %v5100_v2 = vsel %vm470_vm0, %v3711_v7, %v3715_v48  ;;  %4367 = vset.pattern.permute.xlu0 %v4410_v13  ;;  %v3736_v27 = vunpack.i.h.bf16 %v4596_v37  ;;  %v3084_v48 = vld [vmem:[%s5565_s1 + $0x98] sm:$0xff]  ;;  %v2962_v7 = vld [vmem:[%s5566_s2 + $0x8] sm:$0xff] }
 0x135   : > { %3339 = vmatprep.subr.msk.bf16.mxu1 %vm4661_vm4, %v5595_v19  ;;  %v3730_v63 = vunpack.i.l.bf16 %v4598_v38  ;;  %v4086_v26 = vunpack.i.h.bf16 %v4084_v15  ;;  %v4085_v56 = vunpack.i.l.bf16 %v4084_v15  ;;  %1228 = vmatmul.mubr.f32.vlgmr.msra.gmra.mrb[0].mxu1 %v3065_v33  ;;  %v5116_v34 = vsel %vm470_vm0, %v3716_v3, %v3720_v57  ;;  %v3067_v33 = vld [vmem:[%s5565_s1 + $0x50] sm:$0xff] }
 0x136   : > { %3451 = vmatprep.subr.msk.bf16.mxu0 %vm4661_vm4, %v3449_v52  ;;  %v1902_v37 = vsel %vm1899_vm3, %v4081_v21, %v4075_v11  ;;  %v1900_v38 = vsel %vm1899_vm3, %v4080_v17, %v4070_v62  ;;  %v5596_v59 = vpack.c.bf16 %v4889_v49, %v4864_v14  ;;  %1819 = vmatmul.mubr.f32.vlgmr.msra.gmra.mrb[0].mxu0 %v3081_v30  ;;  %v3086_v21 = vld [vmem:[%s5565_s1 + $0xa8] sm:$0xff]  ;;  %v2961_v17 = vld [vmem:[%s5566_s2] sm:$0xff]  ;;  %vm1980_vm8 = vcmask 924672  }
 0x137   : > { %v5129_v52 = vsel %vm470_vm0, %v3731_v50, %v3735_v53  ;;  %v3452_v3 = vpack.c.bf16 %v1902_v37, %v1900_v38  ;;  %v5597_v11 = vpack.c.bf16 %v4924_v16, %v4931_v5  ;;  %v4094_v14 = vpop.permute.xlu1 %4093  ;;  %v4089_v49 = vpop.permute.xlu0 %4088  ;;  %v5137_v62 = vsel %vm470_vm0, %v3720_v57, %v3721_v18  ;;  %3074 = vmatprep.mubr.msk.f32.mxu1 %vm470_vm0, %v3068_v51  ;;  %v3070_v50 = vld [vmem:[%s5565_s1 + $0x68] sm:$0xff]  ;;  %v3083_v16 = vld [vmem:[%s5565_s1 + $0x90] sm:$0xff] }
 0x138   : > { %3342 = vmatpush1.bf16.msk.msra.mxu1 %vm4665_vm5, %v5596_v59  ;;  %v4096_v19 = vunpack.i.h.bf16 %v4094_v14  ;;  %v4095_v15 = vunpack.i.l.bf16 %v4094_v14  ;;  %v4091_v61 = vunpack.i.h.bf16 %v4089_v49  ;;  %v4090_v30 = vunpack.i.l.bf16 %v4089_v49  ;;  %3090 = vmatprep.mubr.msk.f32.mxu0 %vm470_vm0, %v3084_v48  ;;  %v3085_v14 = vld [vmem:[%s5565_s1 + $0xa0] sm:$0xff]  ;;  %v2963_v49 = vld [vmem:[%s5566_s2 + $0x10] sm:$0xff] }
 0x139   : > { %3345 = vmatprep.subr.msk.bf16.mxu1 %vm4661_vm4, %v5597_v11  ;;  %2972 = vperm.xlu1 %4368, %v2962_v7   ;;  %v3745_v5 = vunpack.i.l.bf16 %v4602_v39  ;;  %v1905_v57 = vsel %vm1899_vm3, %v4085_v56, %v4086_v26  ;;  %v5154_v18 = vsel %vm470_vm0, %v3726_v6, %v3730_v63  ;;  %v5157_v13 = vsel %vm470_vm0, %v3735_v53, %v3736_v27  ;;  %v3069_v27 = vld [vmem:[%s5565_s1 + $0x60] sm:$0xff] }
 0x13a   : > { %3454 = vmatpush1.bf16.msk.msra.mxu0 %vm4665_vm5, %v3452_v3  ;;  %1234 = vmatmul.mubr.f32.gmra.mrb[2].mxu1 %v3067_v33  ;;  %v3741_v51 = vunpack.i.h.bf16 %v4604_v40  ;;  %v1904_v26 = vsel %vm1899_vm3, %v4095_v15, %v4085_v56  ;;  %v1906_v35 = vsel %vm1899_vm3, %v4096_v19, %v4090_v30  ;;  %v1907_v6 = vsel %vm1899_vm3, %v4090_v30, %v4091_v61 }
 0x13b   : > { %v5598_v53 = vpack.c.bf16 %v4927_v0, %v4904_v9  ;;  %3075 = vmatprep.mubr.msk.f32.mxu1 %vm470_vm0, %v3070_v50  ;;  %v3740_v63 = vunpack.i.l.bf16 %v4604_v40  ;;  %v3455_v48 = vpack.c.bf16 %v1907_v6, %v1905_v57  ;;  %v3458_v56 = vpack.c.bf16 %v1906_v35, %v1904_v26  ;;  %v4104_v9 = vpop.permute.xlu1 %4103  ;;  %v4099_v0 = vpop.permute.xlu0 %4098  ;;  %1825 = vmatmul.mubr.f32.gmra.mrb[2].mxu0 %v3083_v16  ;;  %v3072_v40 = vld [vmem:[%s5565_s1 + $0x78] sm:$0xff] }
 0x13c   : > { %v5599_v7 = vpack.c.bf16 %v5006_v20, %v4973_v22  ;;  %v4106_v37 = vunpack.i.h.bf16 %v4104_v9  ;;  %v4105_v38 = vunpack.i.l.bf16 %v4104_v9  ;;  %v4101_v59 = vunpack.i.h.bf16 %v4099_v0  ;;  %3091 = vmatprep.mubr.msk.f32.mxu0 %vm470_vm0, %v3086_v21  ;;  %2967 = vperm.xlu0 %4367, %v2961_v17   ;;  %v658_v21 = vld [vmem:[%s5565_s1 + $0x8] sm:$0xff]  ;;  %v2964_v6 = vld [vmem:[%s5566_s2 + $0x18] sm:$0xff] }
 0x13d   : > { %3348 = vmatpush1.bf16.msk.msra.mxu1 %vm4665_vm5, %v5598_v53  ;;  %v4100_v33 = vunpack.i.l.bf16 %v4099_v0  ;;  %v3750_v22 = vunpack.i.l.bf16 %v4610_v42  ;;  %3457 = vmatprep.subr.msk.bf16.mxu0 %vm4661_vm4, %v3455_v48  ;;  %v3361_v20 = vpack.c.bf16 %v5137_v62, %v5100_v2  ;;  %v3363_v3 = vpack.c.bf16 %v5116_v34, %v5071_v25 }
 0x13e   : > { %3351 = vmatprep.subr.msk.bf16.mxu1 %vm4699_vm9, %v5599_v7  ;;  %v3365_v11 = vpack.c.bf16 %v5157_v13, %v5154_v18  ;;  %1240 = vmatmul.mubr.f32.gmra.mrb[4].mxu1 %v3069_v27  ;;  %v3746_v50 = vunpack.i.h.bf16 %v4602_v39  ;;  %v1984_v19 = vsel %vm1980_vm8, %v4105_v38, %v4106_v37  ;;  %v5600_v62 = vpack.c.bf16 %v4997_v28, %v4980_v8  ;;  %v3071_v39 = vld [vmem:[%s5565_s1 + $0x70] sm:$0xff] }
 0x13f   : > { %v1982_v2 = vsel %vm1980_vm8, %v4100_v33, %v4101_v59  ;;  %3460 = vmatpush1.bf16.msk.msra.mxu0 %vm4665_vm5, %v3458_v56  ;;  %v3367_v15 = vpack.c.bf16 %v5129_v52, %v5097_v36  ;;  %v3751_v61 = vunpack.i.h.bf16 %v4610_v42  ;;  %v3766_v30 = vunpack.i.h.bf16 %v4613_v43  ;;  %v4114_v28 = vpop.permute.xlu1 %4113  ;;  %v4109_v57 = vpop.permute.xlu0 %4108  ;;  %3076 = vmatprep.mubr.msk.f32.mxu1 %vm470_vm0, %v3072_v40 }
 0x140   : > { %v3765_v16 = vunpack.i.l.bf16 %v4613_v43  ;;  %v3461_v8 = vpack.c.bf16 %v1984_v19, %v1982_v2  ;;  %v5231_v42 = vsel %vm543_vm6, %v3741_v51, %v3745_v5  ;;  %v5234_v43 = vsel %vm543_vm6, %v3740_v63, %v3741_v51  ;;  %1831 = vmatmul.mubr.f32.gmra.mrb[4].mxu0 %v3085_v14  ;;  %2977 = vperm.xlu1 %4368, %v2963_v49   ;;  %v3087_v51 = vld [vmem:[%s5565_s1 + $0xb0] sm:$0xff] }
 0x141   : > { %3354 = vmatpush1.bf16.msk.msra.mxu1 %vm4703_vm10, %v5600_v62  ;;  %v4111_v17 = vunpack.i.h.bf16 %v4109_v57  ;;  %v4110_v26 = vunpack.i.l.bf16 %v4109_v57  ;;  %v3756_v24 = vunpack.i.h.bf16 %v4608_v41  ;;  %v3761_v35 = vunpack.i.h.bf16 %v4615_v44  ;;  %3092 = vmatprep.mubr.msk.f32.mxu0 %vm470_vm0, %v3088_v29 }
 0x142   : > { %3357 = vmatprep.subr.msk.bf16.mxu1 %vm4699_vm9, %v3355_v10  ;;  %v5241_v10 = vsel %vm543_vm6, %v3746_v50, %v3750_v22  ;;  %v3760_v5 = vunpack.i.l.bf16 %v4615_v44  ;;  %3463 = vmatprep.subr.msk.bf16.mxu0 %vm4699_vm9, %v3461_v8  ;;  %v4116_v53 = vunpack.i.h.bf16 %v4114_v28  ;;  %v4115_v27 = vunpack.i.l.bf16 %v4114_v28  ;;  %v3094_v44 = vld [vmem:[%s5565_s1 + $0xc8] sm:$0xff] }
 0x143   : > { %1246 = vmatmul.mubr.f32.gmra.mrb[6].mxu1 %v3071_v39  ;;  %v1983_v63 = vsel %vm1980_vm8, %v4111_v17, %v4105_v38  ;;  %v1981_v48 = vsel %vm1980_vm8, %v4110_v26, %v4100_v33  ;;  %v3755_v56 = vunpack.i.l.bf16 %v4608_v41  ;;  %v547_v7 = vsel %vm543_vm6, %v3750_v22, %v3751_v61  ;;  %v4124_v37 = vpop.permute.xlu1 %4123  ;;  %v4119_v23 = vpop.permute.xlu0 %4118  ;;  %2982 = vperm.xlu0 %4367, %v2964_v6  }
 0x144   : > { %3077 = vmatprep.mubr.msk.f32.mxu1 %vm470_vm0, %v658_v21  ;;  %v5267_v9 = vsel %vm543_vm6, %v3765_v16, %v3766_v30  ;;  %v3464_v0 = vpack.c.bf16 %v1983_v63, %v1981_v48  ;;  %v4126_v31 = vunpack.i.h.bf16 %v4124_v37  ;;  %v4121_v38 = vunpack.i.h.bf16 %v4119_v23  ;;  %1837 = vmatmul.mubr.f32.gmra.mrb[6].mxu0 %v3087_v51  ;;  %v5601_v21 = vld [vmem:[#allocation5_spill] sm:$0xff]  ;;  %v5603_v51 = vld [vmem:[#allocation7_spill] sm:$0xff] }
 0x145   : > { %3360 = vmatpush1.bf16.msk.msra.mxu1 %vm4703_vm10, %v3358_v12  ;;  %v4125_v12 = vunpack.i.l.bf16 %v4124_v37  ;;  %v4120_v59 = vunpack.i.l.bf16 %v4119_v23  ;;  %v5271_v33 = vsel %vm543_vm6, %v3761_v35, %v3765_v16  ;;  %v549_v41 = vsel %vm543_vm6, %v3756_v24, %v3760_v5  ;;  %3101 = vmatprep.mubr.msk.f32.mxu0 %vm470_vm0, %v3094_v44  ;;  %v5602_v35 = vld [vmem:[#allocation6_spill] sm:$0xff]  ;;  %v5604_v44 = vld [vmem:[#allocation4_spill] sm:$0xff] }
 0x146   : > { %3362 = vmatprep.subr.bf16.mxu1 %v3361_v20  ;;  %v3775_v40 = vunpack.i.l.bf16 %v4623_v46  ;;  %v3771_v22 = vunpack.i.h.bf16 %v4625_v47  ;;  %3466 = vmatpush1.bf16.msk.msra.mxu0 %vm4703_vm10, %v3464_v0  ;;  %v1986_v20 = vsel %vm1980_vm8, %v4115_v27, %v4116_v53  ;;  %v3770_v19 = vunpack.i.l.bf16 %v4625_v47 }
 0x147   : > { %v1985_v14 = vsel %vm1980_vm8, %v4125_v12, %v4115_v27  ;;  %v1987_v49 = vsel %vm1980_vm8, %v4126_v31, %v4120_v59  ;;  %v1988_v50 = vsel %vm1980_vm8, %v4120_v59, %v4121_v38  ;;  %v4134_v39 = vpop.permute.xlu1 %4133  ;;  %v4129_v61 = vpop.permute.xlu0 %4128  ;;  %v548_v57 = vsel %vm543_vm6, %v3755_v56, %v3756_v24 }
 0x148   : > { %v3467_v2 = vpack.c.bf16 %v1988_v50, %v1986_v20  ;;  %v3470_v62 = vpack.c.bf16 %v1987_v49, %v1985_v14  ;;  %v4136_v30 = vunpack.i.h.bf16 %v4134_v39  ;;  %v4135_v16 = vunpack.i.l.bf16 %v4134_v39 }
 0x149   : > { %3364 = vmatpush1.bf16.msra.mxu1 %v3363_v3  ;;  %v4131_v8 = vunpack.i.h.bf16 %v4129_v61  ;;  %v4130_v28 = vunpack.i.l.bf16 %v4129_v61  ;;  %v3781_v25 = vunpack.i.h.bf16 %v5601_v21  ;;  %v3780_v34 = vunpack.i.l.bf16 %v5601_v21 }
 0x14a   : > { %3366 = vmatprep.subr.bf16.mxu1 %v3365_v11  ;;  %3469 = vmatprep.subr.msk.bf16.mxu0 %vm4699_vm9, %v3467_v2  ;;  %v3369_v47 = vpack.c.bf16 %v547_v7, %v5231_v42  ;;  %v3372_v18 = vpack.c.bf16 %v5241_v10, %v5234_v43  ;;  %v2065_v3 = vsel %vm2061_vm12, %v4135_v16, %v4136_v30  ;;  %v3776_v17 = vunpack.i.h.bf16 %v4623_v46 }
 0x14b   : > { %3472 = vmatpush1.bf16.msk.msra.mxu0 %vm4703_vm10, %v3470_v62  ;;  %v2063_v13 = vsel %vm2061_vm12, %v4130_v28, %v4131_v8  ;;  %v3378_v11 = vpack.c.bf16 %v5271_v33, %v548_v57  ;;  %v4144_v42 = vpop.permute.xlu1 %4143  ;;  %v4139_v43 = vpop.permute.xlu0 %4138  ;;  %v3375_v36 = vpack.c.bf16 %v5267_v9, %v549_v41  ;;  %v626_v52 = vsel %vm624_vm11, %v3771_v22, %v3775_v40 }
 0x14c   : > { %v3473_v26 = vpack.c.bf16 %v2065_v3, %v2063_v13  ;;  %v4141_v29 = vunpack.i.h.bf16 %v4139_v43  ;;  %v4140_v24 = vunpack.i.l.bf16 %v4139_v43  ;;  %v628_v10 = vsel %vm624_vm11, %v3780_v34, %v3781_v25 }
 0x14d   : > { %3368 = vmatpush1.bf16.msra.mxu1 %v3367_v15  ;;  %v625_v15 = vsel %vm624_vm11, %v3770_v19, %v3771_v22  ;;  %v3796_v5 = vunpack.i.h.bf16 %v5602_v35  ;;  %v3795_v46 = vunpack.i.l.bf16 %v5602_v35  ;;  %v3790_v6 = vunpack.i.l.bf16 %v5603_v51  ;;  %v660_v35 = vld [vmem:[%s5565_s1 + $0x18] sm:$0xff] }
 0x14e   : > { %3371 = vmatprep.subr.msk.bf16.mxu1 %vm4818_vm2, %v3369_v47  ;;  %3474 = vmatprep.subr.bf16.mxu0 %v3473_v26  ;;  %v4146_v53 = vunpack.i.h.bf16 %v4144_v42  ;;  %v4145_v27 = vunpack.i.l.bf16 %v4144_v42  ;;  %v2064_v63 = vsel %vm2061_vm12, %v4141_v29, %v4135_v16  ;;  %v2062_v48 = vsel %vm2061_vm12, %v4140_v24, %v4130_v28 }
 0x14f   : > { %v3786_v56 = vunpack.i.h.bf16 %v5604_v44  ;;  %v3785_v7 = vunpack.i.l.bf16 %v5604_v44  ;;  %v627_v9 = vsel %vm624_vm11, %v3776_v17, %v3780_v34  ;;  %v3475_v0 = vpack.c.bf16 %v2064_v63, %v2062_v48  ;;  %v4154_v37 = vpop.permute.xlu1 %4153  ;;  %v4149_v23 = vpop.permute.xlu0 %4148  ;;  %v659_v44 = vld [vmem:[%s5565_s1 + $0x10] sm:$0xff] }
 0x150   : > { %v4156_v31 = vunpack.i.h.bf16 %v4154_v37  ;;  %v4155_v12 = vunpack.i.l.bf16 %v4154_v37  ;;  %v4151_v38 = vunpack.i.h.bf16 %v4149_v23  ;;  %v4150_v59 = vunpack.i.l.bf16 %v4149_v23  ;;  %v662_v37 = vld [vmem:[%s5565_s1 + $0x28] sm:$0xff] }
 0x151   : > { %3374 = vmatpush1.bf16.msk.msra.mxu1 %vm4868_vm7, %v3372_v18  ;;  %v632_v33 = vsel %vm624_vm11, %v3795_v46, %v3796_v5  ;;  %v3791_v41 = vunpack.i.h.bf16 %v5603_v51  ;;  %v630_v40 = vsel %vm624_vm11, %v3786_v56, %v3790_v6  ;;  %3476 = vmatpush1.bf16.msra.mxu0 %v3475_v0  ;;  %v3381_v22 = vpack.c.bf16 %v628_v10, %v626_v52 }
 0x152   : > { %3377 = vmatprep.subr.msk.bf16.mxu1 %vm4818_vm2, %v3375_v36  ;;  %v2066_v20 = vsel %vm2061_vm12, %v4155_v12, %v4145_v27  ;;  %v2068_v14 = vsel %vm2061_vm12, %v4156_v31, %v4150_v59  ;;  %v2067_v49 = vsel %vm2061_vm12, %v4145_v27, %v4146_v53  ;;  %v2069_v50 = vsel %vm2061_vm12, %v4150_v59, %v4151_v38 }
 0x153   : > { %v3384_v19 = vpack.c.bf16 %v627_v9, %v625_v15  ;;  %v3479_v2 = vpack.c.bf16 %v2068_v14, %v2066_v20  ;;  %vm2134_vm13 = vcmask 908288   ;;  %v4164_v62 = vpop.permute.xlu1 %4163  ;;  %v4159_v39 = vpop.permute.xlu0 %4158  ;;  %v3477_v61 = vpack.c.bf16 %v2069_v50, %v2067_v49  ;;  %v657_v15 = vld [vmem:[%s5565_s1] sm:$0xff]  ;;  %v664_v14 = vld [vmem:[%s5565_s1 + $0x38] sm:$0xff] }
 0x154   : > { %v4166_v30 = vunpack.i.h.bf16 %v4164_v62  ;;  %v4165_v16 = vunpack.i.l.bf16 %v4164_v62  ;;  %v4161_v8 = vunpack.i.h.bf16 %v4159_v39  ;;  %v4160_v28 = vunpack.i.l.bf16 %v4159_v39 }
 0x155   : > { %3380 = vmatpush1.bf16.msk.msra.mxu1 %vm4868_vm7, %v3378_v11  ;;  %v631_v57 = vsel %vm624_vm11, %v3791_v41, %v3795_v46  ;;  %3478 = vmatprep.subr.bf16.mxu0 %v3477_v61  ;;  %v3387_v21 = vpack.c.bf16 %v632_v33, %v630_v40  ;;  %v629_v47 = vsel %vm624_vm11, %v3785_v7, %v3786_v56  ;;  %v661_v41 = vld [vmem:[%s5565_s1 + $0x20] sm:$0xff]  ;;  %v663_v61 = vld [vmem:[%s5565_s1 + $0x30] sm:$0xff]  ;;  %vm2454_vm3 = vcmask 801792  }
 0x156   : > { %3383 = vmatprep.subr.msk.bf16.mxu1 %vm4960_vm14, %v3381_v22  ;;  %v2138_v25 = vsel %vm2134_vm13, %v4165_v16, %v4166_v30  ;;  %v2136_v34 = vsel %vm2134_vm13, %v4160_v28, %v4161_v8  ;;  %3480 = vmatpush1.bf16.msra.mxu0 %v3479_v2  ;;  %v3390_v11 = vpack.c.bf16 %v631_v57, %v629_v47  ;;  %vm2535_vm6 = vcmask 793600  }
 0x157   : > { %v3481_v18 = vpack.c.bf16 %v2138_v25, %v2136_v34  ;;  %v4174_v13 = vpop.permute.xlu1 %4173  ;;  %v4169_v3 = vpop.permute.xlu0 %4168 }
 0x158   : > { %v4171_v17 = vunpack.i.h.bf16 %v4169_v3  ;;  %v4170_v42 = vunpack.i.l.bf16 %v4169_v3  ;;  %v4176_v43 = vunpack.i.h.bf16 %v4174_v13  ;;  %v4175_v26 = vunpack.i.l.bf16 %v4174_v13 }
 0x159   : > { %3386 = vmatpush1.bf16.msk.msra.mxu1 %vm5001_vm1, %v3384_v19  ;;  %3483 = vmatprep.subr.msk.bf16.mxu0 %vm4818_vm2, %v3481_v18 }
 0x15a   : > { %3389 = vmatprep.subr.msk.bf16.mxu1 %vm4960_vm14, %v3387_v21  ;;  %v2137_v36 = vsel %vm2134_vm13, %v4171_v17, %v4165_v16  ;;  %v2135_v52 = vsel %vm2134_vm13, %v4170_v42, %v4160_v28  ;;  %v2140_v53 = vsel %vm2134_vm13, %v4175_v26, %v4176_v43  ;;  %v3110_v28 = vld [vmem:[%s5565_s1 + $0x128] sm:$0xff] }
 0x15b   : > { %v3484_v29 = vpack.c.bf16 %v2137_v36, %v2135_v52  ;;  %v4184_v24 = vpop.permute.xlu1 %4183  ;;  %v4179_v10 = vpop.permute.xlu0 %4178 }
 0x15c   : > { %v4186_v5 = vunpack.i.h.bf16 %v4184_v24  ;;  %v4185_v46 = vunpack.i.l.bf16 %v4184_v24  ;;  %v4181_v51 = vunpack.i.h.bf16 %v4179_v10  ;;  %v4180_v6 = vunpack.i.l.bf16 %v4179_v10 }
 0x15d   : > { %3392 = vmatpush1.bf16.msk.msra.mxu1 %vm5001_vm1, %v3390_v11  ;;  %3486 = vmatpush1.bf16.msk.msra.mxu0 %vm4868_vm7, %v3484_v29 }
 0x15e   : > { %v2139_v27 = vsel %vm2134_vm13, %v4185_v46, %v4175_v26  ;;  %v2141_v63 = vsel %vm2134_vm13, %v4186_v5, %v4180_v6  ;;  %v2142_v48 = vsel %vm2134_vm13, %v4180_v6, %v4181_v51  ;;  %v3093_v46 = vld [vmem:[%s5565_s1 + $0xc0] sm:$0xff] }
 0x15f   : > { %v3487_v56 = vpack.c.bf16 %v2142_v48, %v2140_v53  ;;  %v3490_v7 = vpack.c.bf16 %v2141_v63, %v2139_v27  ;;  %v4194_v9 = vpop.permute.xlu1 %4193  ;;  %v4189_v0 = vpop.permute.xlu0 %4188  ;;  %v3096_v53 = vld [vmem:[%s5565_s1 + $0xd8] sm:$0xff] }
 0x160   : > { %1329 = vmatmul.mubr.f32.vlgmr.msra.gmra.mrb[0].mxu1 %v657_v15  ;;  %v4196_v23 = vunpack.i.h.bf16 %v4194_v9  ;;  %v4195_v31 = vunpack.i.l.bf16 %v4194_v9  ;;  %v4191_v12 = vunpack.i.h.bf16 %v4189_v0  ;;  %v4190_v38 = vunpack.i.l.bf16 %v4189_v0  ;;  %v3095_v0 = vld [vmem:[%s5565_s1 + $0xd0] sm:$0xff] }
 0x161   : > { %3078 = vmatprep.mubr.msk.f32.mxu1 %vm470_vm0, %v660_v35  ;;  %3489 = vmatprep.subr.msk.bf16.mxu0 %vm4818_vm2, %v3487_v56 }
 0x162   : > { %v2219_v59 = vsel %vm2215_vm15, %v4195_v31, %v4196_v23  ;;  %v2217_v33 = vsel %vm2215_vm15, %v4190_v38, %v4191_v12  ;;  %3492 = vmatpush1.bf16.msk.msra.mxu0 %vm4868_vm7, %v3490_v7 }
 0x163   : > { %v3493_v40 = vpack.c.bf16 %v2219_v59, %v2217_v33  ;;  %v4204_v22 = vpop.permute.xlu1 %4203  ;;  %v4199_v20 = vpop.permute.xlu0 %4198 }
 0x164   : > { %1335 = vmatmul.mubr.f32.gmra.mrb[2].mxu1 %v659_v44  ;;  %v4201_v49 = vunpack.i.h.bf16 %v4199_v20  ;;  %v4200_v50 = vunpack.i.l.bf16 %v4199_v20  ;;  %v4206_v19 = vunpack.i.h.bf16 %v4204_v22  ;;  %v4205_v2 = vunpack.i.l.bf16 %v4204_v22 }
 0x165   : > { %3079 = vmatprep.mubr.msk.f32.mxu1 %vm470_vm0, %v662_v37  ;;  %3495 = vmatprep.subr.msk.bf16.mxu0 %vm4960_vm14, %v3493_v40 }
 0x166   : > { %v2218_v62 = vsel %vm2215_vm15, %v4201_v49, %v4195_v31  ;;  %v2216_v39 = vsel %vm2215_vm15, %v4200_v50, %v4190_v38  ;;  %v2221_v47 = vsel %vm2215_vm15, %v4205_v2, %v4206_v19  ;;  %v3098_v38 = vld [vmem:[%s5565_s1 + $0xe8] sm:$0xff] }
 0x167   : > { %v3496_v30 = vpack.c.bf16 %v2218_v62, %v2216_v39  ;;  %v4214_v16 = vpop.permute.xlu1 %4213  ;;  %v4209_v8 = vpop.permute.xlu0 %4208  ;;  %v3097_v39 = vld [vmem:[%s5565_s1 + $0xe0] sm:$0xff] }
 0x168   : > { %1341 = vmatmul.mubr.f32.gmra.mrb[4].mxu1 %v661_v41  ;;  %v4216_v57 = vunpack.i.h.bf16 %v4214_v16  ;;  %v4215_v21 = vunpack.i.l.bf16 %v4214_v16  ;;  %v4211_v25 = vunpack.i.h.bf16 %v4209_v8  ;;  %v4210_v34 = vunpack.i.l.bf16 %v4209_v8 }
 0x169   : > { %3080 = vmatprep.mubr.msk.f32.mxu1 %vm470_vm0, %v664_v14  ;;  %3498 = vmatpush1.bf16.msk.msra.mxu0 %vm5001_vm1, %v3496_v30 }
 0x16a   : > { %v2220_v18 = vsel %vm2215_vm15, %v4215_v21, %v4205_v2  ;;  %v2222_v13 = vsel %vm2215_vm15, %v4216_v57, %v4210_v34  ;;  %v2223_v3 = vsel %vm2215_vm15, %v4210_v34, %v4211_v25  ;;  %v3099_v25 = vld [vmem:[%s5565_s1 + $0xf0] sm:$0xff] }
 0x16b   : > { %v3499_v11 = vpack.c.bf16 %v2223_v3, %v2221_v47  ;;  %v3502_v17 = vpack.c.bf16 %v2222_v13, %v2220_v18  ;;  %v4224_v42 = vpop.permute.xlu1 %4223  ;;  %v4219_v43 = vpop.permute.xlu0 %4218 }
 0x16c   : > { %1347 = vmatmul.mubr.f32.gmra.mrb[6].mxu1 %v663_v61  ;;  %v4226_v26 = vunpack.i.h.bf16 %v4224_v42  ;;  %v4225_v36 = vunpack.i.l.bf16 %v4224_v42  ;;  %v4221_v52 = vunpack.i.h.bf16 %v4219_v43  ;;  %v4220_v15 = vunpack.i.l.bf16 %v4219_v43  ;;  %v3100_v61 = vld [vmem:[%s5565_s1 + $0xf8] sm:$0xff] }
 0x16d   : > { %3115 = vmatprep.mubr.msk.f32.mxu1 %vm470_vm0, %v3110_v28  ;;  %3501 = vmatprep.subr.msk.bf16.mxu0 %vm4960_vm14, %v3499_v11 }
 0x16e   : > { %v2458_v29 = vsel %vm2454_vm3, %v4225_v36, %v4226_v26  ;;  %v2456_v24 = vsel %vm2454_vm3, %v4220_v15, %v4221_v52  ;;  %3504 = vmatpush1.bf16.msk.msra.mxu0 %vm5001_vm1, %v3502_v17 }
 0x16f   : > { %v3505_v10 = vpack.c.bf16 %v2458_v29, %v2456_v24  ;;  %v4234_v35 = vpop.permute.xlu1 %4233  ;;  %v4229_v5 = vpop.permute.xlu0 %4228 }
 0x170   : > { %v4231_v51 = vunpack.i.h.bf16 %v4229_v5  ;;  %v4230_v6 = vunpack.i.l.bf16 %v4229_v5  ;;  %v4236_v27 = vunpack.i.h.bf16 %v4234_v35  ;;  %v4235_v63 = vunpack.i.l.bf16 %v4234_v35 }
 0x171   : > { %3507 = vmatprep.subr.msk.bf16.mxu0 %vm4661_vm4, %v3505_v10  ;;  %3561 = vmatprep.subr.msk.bf16.mxu1 %vm4661_vm4, %v3505_v10 }
 0x172   : > { %v2457_v48 = vsel %vm2454_vm3, %v4231_v51, %v4225_v36  ;;  %v2455_v44 = vsel %vm2454_vm3, %v4230_v6, %v4220_v15  ;;  %2374 = vmatmul.mubr.f32.vlgmr.msra.gmra.mrb[0].mxu0 %v3093_v46  ;;  %v2460_v59 = vsel %vm2454_vm3, %v4235_v63, %v4236_v27 }
 0x173   : > { %v3508_v56 = vpack.c.bf16 %v2457_v48, %v2455_v44  ;;  %v4244_v7 = vpop.permute.xlu1 %4243  ;;  %v4239_v9 = vpop.permute.xlu0 %4238  ;;  %3102 = vmatprep.mubr.msk.f32.mxu0 %vm470_vm0, %v3096_v53 }
 0x174   : > { %v4246_v37 = vunpack.i.h.bf16 %v4244_v7  ;;  %v4245_v23 = vunpack.i.l.bf16 %v4244_v7  ;;  %v4241_v31 = vunpack.i.h.bf16 %v4239_v9  ;;  %v4240_v12 = vunpack.i.l.bf16 %v4239_v9 }
 0x175   : > { %3510 = vmatpush1.bf16.msk.msra.mxu0 %vm4665_vm5, %v3508_v56  ;;  %3571 = vmatpush1.bf16.msk.msra.mxu1 %vm4665_vm5, %v3508_v56 }
 0x176   : > { %v2459_v33 = vsel %vm2454_vm3, %v4245_v23, %v4235_v63  ;;  %v2461_v41 = vsel %vm2454_vm3, %v4246_v37, %v4240_v12  ;;  %v2462_v40 = vsel %vm2454_vm3, %v4240_v12, %v4241_v31  ;;  %2380 = vmatmul.mubr.f32.gmra.mrb[2].mxu0 %v3095_v0 }
 0x177   : > { %v3511_v22 = vpack.c.bf16 %v2462_v40, %v2460_v59  ;;  %v3514_v20 = vpack.c.bf16 %v2461_v41, %v2459_v33  ;;  %v4254_v14 = vpop.permute.xlu1 %4253  ;;  %v4249_v49 = vpop.permute.xlu0 %4248  ;;  %3103 = vmatprep.mubr.msk.f32.mxu0 %vm470_vm0, %v3098_v38 }
 0x178   : > { %v4256_v50 = vunpack.i.h.bf16 %v4254_v14  ;;  %v4255_v19 = vunpack.i.l.bf16 %v4254_v14  ;;  %v4251_v2 = vunpack.i.h.bf16 %v4249_v49  ;;  %v4250_v62 = vunpack.i.l.bf16 %v4249_v49 }
 0x179   : > { %3513 = vmatprep.subr.msk.bf16.mxu0 %vm4661_vm4, %v3511_v22  ;;  %3562 = vmatprep.subr.msk.bf16.mxu1 %vm4661_vm4, %v3511_v22  ;;  %vm2616_vm4 = vcmask 785408  }
 0x17a   : > { %v2539_v30 = vsel %vm2535_vm6, %v4255_v19, %v4256_v50  ;;  %v2537_v16 = vsel %vm2535_vm6, %v4250_v62, %v4251_v2  ;;  %3516 = vmatpush1.bf16.msk.msra.mxu0 %vm4665_vm5, %v3514_v20  ;;  %3572 = vmatpush1.bf16.msk.msra.mxu1 %vm4665_vm5, %v3514_v20  ;;  %vm2689_vm5 = vcmask 777216  }
 0x17b   : > { %v3517_v8 = vpack.c.bf16 %v2539_v30, %v2537_v16  ;;  %v4264_v28 = vpop.permute.xlu1 %4263  ;;  %v4259_v57 = vpop.permute.xlu0 %4258  ;;  %2386 = vmatmul.mubr.f32.gmra.mrb[4].mxu0 %v3097_v39 }
 0x17c   : > { %v4261_v55 = vunpack.i.h.bf16 %v4259_v57  ;;  %v4260_v21 = vunpack.i.l.bf16 %v4259_v57  ;;  %3104 = vmatprep.mubr.msk.f32.mxu0 %vm470_vm0, %v3100_v61  ;;  %v4266_v34 = vunpack.i.h.bf16 %v4264_v28  ;;  %v4265_v47 = vunpack.i.l.bf16 %v4264_v28 }
 0x17d   : > { %3519 = vmatprep.subr.msk.bf16.mxu0 %vm4699_vm9, %v3517_v8  ;;  %3563 = vmatprep.subr.msk.bf16.mxu1 %vm4699_vm9, %v3517_v8 }
 0x17e   : > { %v2538_v18 = vsel %vm2535_vm6, %v4261_v55, %v4255_v19  ;;  %v2536_v13 = vsel %vm2535_vm6, %v4260_v21, %v4250_v62  ;;  %v2541_v52 = vsel %vm2535_vm6, %v4265_v47, %v4266_v34 }
 0x17f   : > { %v3520_v3 = vpack.c.bf16 %v2538_v18, %v2536_v13  ;;  %v4274_v11 = vpop.permute.xlu1 %4273  ;;  %v4269_v17 = vpop.permute.xlu0 %4268  ;;  %2392 = vmatmul.mubr.f32.gmra.mrb[6].mxu0 %v3099_v25 }
 0x180   : > { %v4276_v42 = vunpack.i.h.bf16 %v4274_v11  ;;  %v4275_v43 = vunpack.i.l.bf16 %v4274_v11  ;;  %v4271_v26 = vunpack.i.h.bf16 %v4269_v17  ;;  %v4270_v36 = vunpack.i.l.bf16 %v4269_v17  ;;  %3113 = vmatprep.mubr.msk.f32.mxu0 %vm470_vm0, %v3106_v60 }
 0x181   : > { %3522 = vmatpush1.bf16.msk.msra.mxu0 %vm4703_vm10, %v3520_v3  ;;  %3573 = vmatpush1.bf16.msk.msra.mxu1 %vm4703_vm10, %v3520_v3 }
 0x182   : > { %v2540_v15 = vsel %vm2535_vm6, %v4275_v43, %v4265_v47  ;;  %v2542_v29 = vsel %vm2535_vm6, %v4276_v42, %v4270_v36  ;;  %v2543_v24 = vsel %vm2535_vm6, %v4270_v36, %v4271_v26 }
 0x183   : > { %v3523_v10 = vpack.c.bf16 %v2543_v24, %v2541_v52  ;;  %v3526_v35 = vpack.c.bf16 %v2542_v29, %v2540_v15  ;;  %v4284_v5 = vpop.permute.xlu1 %4283  ;;  %v4279_v46 = vpop.permute.xlu0 %4278 }
 0x184   : > { %v4286_v51 = vunpack.i.h.bf16 %v4284_v5  ;;  %v4285_v6 = vunpack.i.l.bf16 %v4284_v5  ;;  %v4281_v53 = vunpack.i.h.bf16 %v4279_v46  ;;  %v4280_v27 = vunpack.i.l.bf16 %v4279_v46 }
 0x185   : > { %3525 = vmatprep.subr.msk.bf16.mxu0 %vm4699_vm9, %v3523_v10  ;;  %3564 = vmatprep.subr.msk.bf16.mxu1 %vm4699_vm9, %v3523_v10  ;;  %vm2770_vm9 = vcmask 769024  }
 0x186   : > { %3528 = vmatpush1.bf16.msk.msra.mxu0 %vm4703_vm10, %v3526_v35  ;;  %3574 = vmatpush1.bf16.msk.msra.mxu1 %vm4703_vm10, %v3526_v35  ;;  %v2618_v63 = vsel %vm2616_vm4, %v4280_v27, %v4281_v53  ;;  %v2620_v48 = vsel %vm2616_vm4, %v4285_v6, %v4286_v51 }
 0x187   : > { %v4294_v44 = vpop.permute.xlu1 %4293  ;;  %v4289_v56 = vpop.permute.xlu0 %4288  ;;  %v3529_v7 = vpack.c.bf16 %v2620_v48, %v2618_v63 }
 0x188   : > { %v4291_v9 = vunpack.i.h.bf16 %v4289_v56  ;;  %v4290_v0 = vunpack.i.l.bf16 %v4289_v56  ;;  %v4296_v37 = vunpack.i.h.bf16 %v4294_v44  ;;  %v4295_v45 = vunpack.i.l.bf16 %v4294_v44 }
 0x189   : > { %3530 = vmatprep.subr.bf16.mxu0 %v3529_v7  ;;  %3565 = vmatprep.subr.bf16.mxu1 %v3529_v7 }
 0x18a   : > { %v2619_v23 = vsel %vm2616_vm4, %v4291_v9, %v4285_v6  ;;  %v2617_v31 = vsel %vm2616_vm4, %v4290_v0, %v4280_v27  ;;  %v2622_v14 = vsel %vm2616_vm4, %v4295_v45, %v4296_v37 }
 0x18b   : > { %v3531_v12 = vpack.c.bf16 %v2619_v23, %v2617_v31  ;;  %v4304_v4 = vpop.permute.xlu1 %4303  ;;  %v4299_v38 = vpop.permute.xlu0 %4298 }
 0x18c   : > { %v4306_v59 = vunpack.i.h.bf16 %v4304_v4  ;;  %v4305_v33 = vunpack.i.l.bf16 %v4304_v4  ;;  %v4301_v41 = vunpack.i.h.bf16 %v4299_v38  ;;  %v4300_v40 = vunpack.i.l.bf16 %v4299_v38 }
 0x18d   : > { %3532 = vmatpush1.bf16.msra.mxu0 %v3531_v12  ;;  %3575 = vmatpush1.bf16.msra.mxu1 %v3531_v12 }
 0x18e   : > { %v2621_v22 = vsel %vm2616_vm4, %v4305_v33, %v4295_v45  ;;  %v2623_v20 = vsel %vm2616_vm4, %v4306_v59, %v4300_v40  ;;  %v2624_v49 = vsel %vm2616_vm4, %v4300_v40, %v4301_v41 }
 0x18f   : > { %v3535_v50 = vpack.c.bf16 %v2623_v20, %v2621_v22  ;;  %v4314_v19 = vpop.permute.xlu1 %4313  ;;  %v4309_v2 = vpop.permute.xlu0 %4308  ;;  %v3533_v62 = vpack.c.bf16 %v2624_v49, %v2622_v14 }
 0x190   : > { %v4316_v39 = vunpack.i.h.bf16 %v4314_v19  ;;  %v4315_v61 = vunpack.i.l.bf16 %v4314_v19  ;;  %v4311_v30 = vunpack.i.h.bf16 %v4309_v2  ;;  %v4310_v16 = vunpack.i.l.bf16 %v4309_v2  ;;  %v3109_v19 = vld [vmem:[%s5565_s1 + $0x120] sm:$0xff]  ;;  %v3108_v2 = vld [vmem:[%s5565_s1 + $0x118] sm:$0xff] }
 0x191   : > { %3534 = vmatprep.subr.bf16.mxu0 %v3533_v62  ;;  %3566 = vmatprep.subr.bf16.mxu1 %v3533_v62  ;;  %v3111_v62 = vld [vmem:[%s5565_s1 + $0x130] sm:$0xff] }
 0x192   : > { %v2693_v8 = vsel %vm2689_vm5, %v4315_v61, %v4316_v39  ;;  %v2691_v28 = vsel %vm2689_vm5, %v4310_v16, %v4311_v30  ;;  %3536 = vmatpush1.bf16.msra.mxu0 %v3535_v50  ;;  %3576 = vmatpush1.bf16.msra.mxu1 %v3535_v50  ;;  %v3105_v50 = vld [vmem:[%s5565_s1 + $0x100] sm:$0xff] }
 0x193   : > { %v3537_v57 = vpack.c.bf16 %v2693_v8, %v2691_v28  ;;  %v4324_v55 = vpop.permute.xlu1 %4323  ;;  %v4319_v21 = vpop.permute.xlu0 %4318 }
 0x194   : > { %v4321_v25 = vunpack.i.h.bf16 %v4319_v21  ;;  %v4320_v60 = vunpack.i.l.bf16 %v4319_v21  ;;  %v4326_v34 = vunpack.i.h.bf16 %v4324_v55  ;;  %v4325_v47 = vunpack.i.l.bf16 %v4324_v55 }
 0x195   : > { %3539 = vmatprep.subr.msk.bf16.mxu0 %vm4818_vm2, %v3537_v57  ;;  %3567 = vmatprep.subr.msk.bf16.mxu1 %vm4818_vm2, %v3537_v57 }
 0x196   : > { %v2692_v18 = vsel %vm2689_vm5, %v4321_v25, %v4315_v61  ;;  %v2690_v13 = vsel %vm2689_vm5, %v4320_v60, %v4310_v16  ;;  %v2695_v52 = vsel %vm2689_vm5, %v4325_v47, %v4326_v34 }
 0x197   : > { %v3540_v3 = vpack.c.bf16 %v2692_v18, %v2690_v13  ;;  %v4334_v11 = vpop.permute.xlu1 %4333  ;;  %v4329_v17 = vpop.permute.xlu0 %4328 }
 0x198   : > { %v4336_v42 = vunpack.i.h.bf16 %v4334_v11  ;;  %v4335_v43 = vunpack.i.l.bf16 %v4334_v11  ;;  %v4331_v26 = vunpack.i.h.bf16 %v4329_v17  ;;  %v4330_v36 = vunpack.i.l.bf16 %v4329_v17 }
 0x199   : > { %3542 = vmatpush1.bf16.msk.msra.mxu0 %vm4868_vm7, %v3540_v3  ;;  %3577 = vmatpush1.bf16.msk.msra.mxu1 %vm4868_vm7, %v3540_v3 }
 0x19a   : > { %v2694_v15 = vsel %vm2689_vm5, %v4335_v43, %v4325_v47  ;;  %v2696_v29 = vsel %vm2689_vm5, %v4336_v42, %v4330_v36  ;;  %v2697_v24 = vsel %vm2689_vm5, %v4330_v36, %v4331_v26 }
 0x19b   : > { %v3543_v10 = vpack.c.bf16 %v2697_v24, %v2695_v52  ;;  %v3546_v35 = vpack.c.bf16 %v2696_v29, %v2694_v15  ;;  %v4344_v5 = vpop.permute.xlu1 %4343  ;;  %v4339_v46 = vpop.permute.xlu0 %4338 }
 0x19c   : > { %v4346_v51 = vunpack.i.h.bf16 %v4344_v5  ;;  %v4345_v6 = vunpack.i.l.bf16 %v4344_v5  ;;  %v4341_v53 = vunpack.i.h.bf16 %v4339_v46  ;;  %v4340_v27 = vunpack.i.l.bf16 %v4339_v46 }
 0x19d   : > { %3545 = vmatprep.subr.msk.bf16.mxu0 %vm4818_vm2, %v3543_v10  ;;  %3568 = vmatprep.subr.msk.bf16.mxu1 %vm4818_vm2, %v3543_v10 }
 0x19e   : > { %v2774_v63 = vsel %vm2770_vm9, %v4345_v6, %v4346_v51  ;;  %v2772_v48 = vsel %vm2770_vm9, %v4340_v27, %v4341_v53  ;;  %3548 = vmatpush1.bf16.msk.msra.mxu0 %vm4868_vm7, %v3546_v35  ;;  %3578 = vmatpush1.bf16.msk.msra.mxu1 %vm4868_vm7, %v3546_v35 }
 0x19f   : > { %v3549_v44 = vpack.c.bf16 %v2774_v63, %v2772_v48  ;;  %v4354_v56 = vpop.permute.xlu1 %4353  ;;  %v4349_v7 = vpop.permute.xlu0 %4348 }
 0x1a0   : > { %v4351_v9 = vunpack.i.h.bf16 %v4349_v7  ;;  %v4350_v0 = vunpack.i.l.bf16 %v4349_v7  ;;  %v4356_v32 = vunpack.i.h.bf16 %v4354_v56  ;;  %v4355_v37 = vunpack.i.l.bf16 %v4354_v56 }
 0x1a1   : > { %3551 = vmatprep.subr.msk.bf16.mxu0 %vm4960_vm14, %v3549_v44  ;;  %3569 = vmatprep.subr.msk.bf16.mxu1 %vm4960_vm14, %v3549_v44 }
 0x1a2   : > { %v2773_v45 = vsel %vm2770_vm9, %v4351_v9, %v4345_v6  ;;  %v2771_v23 = vsel %vm2770_vm9, %v4350_v0, %v4340_v27  ;;  %v2776_v41 = vsel %vm2770_vm9, %v4355_v37, %v4356_v32 }
 0x1a3   : > { %v3552_v31 = vpack.c.bf16 %v2773_v45, %v2771_v23  ;;  %v4364_v54 = vpop.permute.xlu1 %4363  ;;  %v4359_v12 = vpop.permute.xlu0 %4358 }
 0x1a4   : > { %v4366_v4 = vunpack.i.h.bf16 %v4364_v54  ;;  %v4365_v38 = vunpack.i.l.bf16 %v4364_v54  ;;  %v4361_v59 = vunpack.i.h.bf16 %v4359_v12  ;;  %v4360_v33 = vunpack.i.l.bf16 %v4359_v12 }
 0x1a5   : > { %3554 = vmatpush1.bf16.msk.msra.mxu0 %vm5001_vm1, %v3552_v31  ;;  %3579 = vmatpush1.bf16.msk.msra.mxu1 %vm5001_vm1, %v3552_v31 }
 0x1a6   : > { %v2775_v40 = vsel %vm2770_vm9, %v4365_v38, %v4355_v37  ;;  %v2777_v22 = vsel %vm2770_vm9, %v4366_v4, %v4360_v33  ;;  %v2778_v20 = vsel %vm2770_vm9, %v4360_v33, %v4361_v59 }
 0x1a7   : > { %v3555_v14 = vpack.c.bf16 %v2778_v20, %v2776_v41  ;;  %v3558_v49 = vpack.c.bf16 %v2777_v22, %v2775_v40 }
 0x1a9   : > { %3557 = vmatprep.subr.msk.bf16.mxu0 %vm4960_vm14, %v3555_v14  ;;  %3570 = vmatprep.subr.msk.bf16.mxu1 %vm4960_vm14, %v3555_v14 }
 0x1aa   : > { %3560 = vmatpush1.bf16.msk.msra.mxu0 %vm5001_vm1, %v3558_v49  ;;  %3580 = vmatpush1.bf16.msk.msra.mxu1 %vm5001_vm1, %v3558_v49 }
 0x1ad   : > { %2929 = vmatmul.mubr.f32.vlgmr.msra.gmra.mrb[0].mxu0 %v3105_v50  ;;  %2941 = vmatmul.mubr.f32.vlgmr.msra.gmra.mrb[8].mxu1 %v3109_v19 }
 0x1ae   : > { %3114 = vmatprep.mubr.msk.f32.mxu0 %vm470_vm0, %v3108_v2  ;;  %3116 = vmatprep.mubr.msk.f32.mxu1 %vm470_vm0, %v3112_v1 }
 0x1b1   : > { %2935 = vmatmul.mubr.f32.gmra.mrb[2].mxu0 %v3107_v58  ;;  %2947 = vmatmul.mubr.f32.gmra.mrb[10].mxu1 %v3111_v62 }
 0x1b8   : > { %v2973_v11 = vpop.permute.xlu1 %2972 }
 0x1bb   : > { %v2968_v17 = vpop.permute.xlu0 %2967 }
 0x1bf   : > { %v2978_v42 = vpop.permute.xlu1 %2977 }
 0x1c2   : > { %v2983_v56 = vpop.permute.xlu0 %2982 }
 0x233   : > { %v1330_v39 = vpop.f32.mrb[0].mxu1 }
 0x234   : > { %v1332_v61 = vpop.f32.mrb[1].mxu1 }
 0x237   : > { %v1336_v30 = vpop.f32.mrb[2].mxu1 }
 0x238   : > { %v1338_v16 = vpop.f32.mrb[3].mxu1 }
 0x23b   : > { %v1342_v8 = vpop.f32.mrb[4].mxu1 }
 0x23c   : > { %v1344_v28 = vpop.f32.mrb[5].mxu1 }
 0x23f   : > { %v1348_v57 = vpop.f32.mrb[6].mxu1 }
 0x240   : > { %v1350_v55 = vpop.f32.mrb[7].mxu1 }
 0x24e   : > { %v2387_v21 = vpop.f32.mrb[4].mxu0 }
 0x24f   : > { %v3585_v25 = vadd.f32 %v2387_v21, %v1342_v8  ;;  %v2389_v60 = vpop.f32.mrb[5].mxu0 }
 0x250   : > { %v3587_v34 = vadd.f32 %v2389_v60, %v1344_v28 }
 0x252   : > { %v2393_v47 = vpop.f32.mrb[6].mxu0 }
 0x253   : > { %v3589_v18 = vadd.f32 %v2393_v47, %v1348_v57  ;;  %v2395_v13 = vpop.f32.mrb[7].mxu0 }
 0x254   : > { %v3591_v3 = vadd.f32 %v2395_v13, %v1350_v55 }
 0x280   : > { %v2930_v43 = vpop.f32.mrb[0].mxu0  ;;  %v2942_v26 = vpop.f32.mrb[8].mxu1 }
 0x281   : > { %v3581_v36 = vadd.f32 %v2930_v43, %v1330_v39  ;;  %v3586_v52 = vadd.f32 %v3585_v25, %v2942_v26  ;;  %v2932_v15 = vpop.f32.mrb[1].mxu0  ;;  %v2944_v29 = vpop.f32.mrb[9].mxu1 }
 0x282   : > { %v3582_v24 = vadd.f32 %v2932_v15, %v1332_v61  ;;  %v3588_v10 = vadd.f32 %v3587_v34, %v2944_v29 }
 0x283   : > { %v2985_v35 = vadd.f32 %v3581_v36, %v2968_v17  ;;  %v2989_v5 = vadd.f32 %v3586_v52, %v2978_v42 }
 0x284   : > { %v2986_v46 = vadd.f32 %v3582_v24, %v2968_v17  ;;  %v2990_v51 = vadd.f32 %v3588_v10, %v2978_v42  ;;  %v2936_v6 = vpop.f32.mrb[2].mxu0  ;;  %v2948_v53 = vpop.f32.mrb[10].mxu1 }
 0x285   : > { %2993 = vst [vmem:[%s170_s9] sm:$0xff] %v2985_v35  ;;  %2997 = vst [vmem:[%s170_s9 + $0x20] sm:$0xff] %v2989_v5  ;;  %v3583_v27 = vadd.f32 %v2936_v6, %v1336_v30  ;;  %v3590_v63 = vadd.f32 %v3589_v18, %v2948_v53  ;;  %v2938_v48 = vpop.f32.mrb[3].mxu0  ;;  %v2950_v44 = vpop.f32.mrb[11].mxu1 }
 0x286   : > { %2994 = vst [vmem:[%s170_s9 + $0x8] sm:$0xff] %v2986_v46  ;;  %2998 = vst [vmem:[%s170_s9 + $0x28] sm:$0xff] %v2990_v51  ;;  %v3584_v7 = vadd.f32 %v2938_v48, %v1338_v16  ;;  %v3592_v9 = vadd.f32 %v3591_v3, %v2950_v44 }
 0x287   : > { %v2987_v0 = vadd.f32 %v3583_v27, %v2973_v11  ;;  %v2991_v32 = vadd.f32 %v3590_v63, %v2983_v56 }
 0x288   : > { %v2988_v37 = vadd.f32 %v3584_v7, %v2973_v11  ;;  %v2992_v45 = vadd.f32 %v3592_v9, %v2983_v56 }
 0x289   : > { %2995 = vst [vmem:[%s170_s9 + $0x10] sm:$0xff] %v2987_v0  ;;  %2999 = vst [vmem:[%s170_s9 + $0x30] sm:$0xff] %v2991_v32 }
 0x28a   : > { %2996 = vst [vmem:[%s170_s9 + $0x18] sm:$0xff] %v2988_v37  ;;  %3000 = vst [vmem:[%s170_s9 + $0x38] sm:$0xff] %v2992_v45 }
 0x28b PF: > { %s13_s12 = sadd.s32 1, %s4383_s12  }
 0x28c   : > { %p10_p4 = scmp.ge.s32.totalorder %s13_s12, 4  }
 0x28e   :  { %12 = sbr.rel (!%p10_p4) target bundleno = 1 (0x1), region = 66 }

</bundles_post_ra>
